<compile_context>
chip_gen: v6e
topology: v6e:2x2x1
jax: 0.10.0
libtpu: 0.0.40
codegen_flags: <defaults>
</compile_context>

<pallas_src>
import jax
import jax.numpy as jnp
from jax.experimental import pallas as pl
from jax.experimental.pallas import tpu as pltpu

_MIB = 1024 * 1024


def _round_up(x, m):
    return ((x + m - 1) // m) * m


def _vmem_bytes(shape, dtype):
    """Tile-padded VMEM footprint of one buffer (last dim -> 128 lanes,
    second-to-last -> 8 sublanes)."""
    s = list(shape)
    if len(s) >= 1:
        s[-1] = _round_up(s[-1], 128)
    if len(s) >= 2:
        s[-2] = _round_up(s[-2], 8)
    n = 1
    for d in s:
        n *= int(d)
    return n * jnp.dtype(dtype).itemsize


# ---------------------------------------------------------------------------
# Fused multi-layer LSTM: grid = (batch_split, layers); recurrence inside.
# Sequence buffers are time-major (T, Bc, .); gate order is i | f | o | g
# (permuted at pack time).
# ---------------------------------------------------------------------------
def _lstm_stack_kernel(x0_ref, wih0_ref, b0_ref, wih_ref, whh_ref, b_ref,
                       h0_ref, c0_ref, y_ref, hT_ref, cT_ref,
                       gates_sc, h_sc, c_sc):
    l = pl.program_id(1)                    # layer index (axis 0 = batch split)
    Bc, H = h_sc.shape
    G = 4 * H
    TC = gates_sc.shape[0] // Bc            # time-chunk length (timesteps)
    T = y_ref.shape[0]
    E = x0_ref.shape[-1]
    n_chunks = T // TC

    h_sc[...] = h0_ref[0]
    c_sc[...] = c0_ref[0]

    def chunk_body(ci, carry):
        t0 = pl.multiple_of(ci * TC, TC)

        # ---- hoisted input projection: ONE MXU matmul per time chunk ----
        # (bias folded in; VMEM for gates is O(TC), not O(T))
        @pl.when(l == 0)
        def _():
            xc = x0_ref[pl.ds(t0, TC)].reshape(TC * Bc, E)     # (TC*Bc, E)
            gates_sc[...] = (jnp.dot(xc.astype(wih0_ref.dtype), wih0_ref[...],
                                     preferred_element_type=jnp.float32)
                             + b0_ref[...])

        @pl.when(l > 0)
        def _():
            # Previous layer's output rows for this chunk are still resident in
            # y_ref (constant-index output block) and not yet overwritten.
            yc = y_ref[pl.ds(t0, TC)].reshape(TC * Bc, H)      # (TC*Bc, H)
            gates_sc[...] = (jnp.dot(yc.astype(wih_ref.dtype), wih_ref[0],
                                     preferred_element_type=jnp.float32)
                             + b_ref[0])

        # ---- serial recurrence: only h @ W_hh + gate math per step ----
        def step(tt, carry2):
            r0 = pl.multiple_of(tt * Bc, Bc)    # Bc % 8 == 0 -> sublane aligned
            gates = gates_sc[pl.ds(r0, Bc), :] + jnp.dot(
                h_sc[...].astype(whh_ref.dtype), whh_ref[0],
                preferred_element_type=jnp.float32)            # (Bc, 4H)
            # packed gate order i|f|o|g: one sigmoid over 3H cols + one tanh
            # over H cols (half the EUP work of activating all 4H twice).
            sig = jax.nn.sigmoid(gates[:, :3 * H])
            g_g = jnp.tanh(gates[:, 3 * H:])
            i_g = sig[:, 0 * H:1 * H]
            f_g = sig[:, 1 * H:2 * H]
            o_g = sig[:, 2 * H:3 * H]
            c_new = f_g * c_sc[...] + i_g * g_g
            h_new = o_g * jnp.tanh(c_new)
            c_sc[...] = c_new
            h_sc[...] = h_new
            y_ref[t0 + tt] = h_new
            return carry2

        jax.lax.fori_loop(0, TC, step, 0, unroll=min(8, TC))
        return carry

    jax.lax.fori_loop(0, n_chunks, chunk_body, 0)

    # per-(layer, batch-split) final states
    hT_ref[0] = h_sc[...]
    cT_ref[0] = c_sc[...]


def lstm_stack(x_tm, w_ih0, b0, w_ih_rest, w_hh, b_rest, h0, c0, *,
               nsplit=1, gates_budget_bytes=8 * _MIB):
    """x_tm: (T, Bp, E) time-major, Bp % (8*nsplit) == 0.
    Returns y (T, Bp, H) plus final (L, Bp, H) h/c states."""
    T, Bp, E = x_tm.shape
    L, Bp2, H = h0.shape
    assert Bp == Bp2 and Bp % nsplit == 0 and (Bp // nsplit) % 8 == 0
    G = 4 * H
    Bc = Bp // nsplit
    wdt = w_ih0.dtype
    f32 = jnp.float32

    # time-chunk so the per-chunk gate scratch stays within budget
    per_step = _vmem_bytes((Bc, G), f32)
    TC = 1
    for t in range(1, T + 1):
        if T % t == 0 and t * per_step <= gates_budget_bytes:
            TC = t

    # ---- explicit VMEM arithmetic (double-buffered blocks + scratch) ----
    est = (2 * _vmem_bytes((T, Bc, E), f32)       # x0 block
           + 2 * _vmem_bytes((E, G), wdt)         # W_ih layer 0
           + 2 * _vmem_bytes((1, G), f32)         # bias layer 0
           + 2 * _vmem_bytes((H, G), wdt)         # W_ih layers > 0 (one block)
           + 2 * _vmem_bytes((H, G), wdt)         # W_hh (one block)
           + 2 * _vmem_bytes((1, G), f32)         # bias layers > 0
           + 4 * _vmem_bytes((Bc, H), f32)        # h0, c0 blocks
           + 2 * _vmem_bytes((T, Bc, H), f32)     # resident y output
           + 4 * _vmem_bytes((Bc, H), f32)        # hT, cT blocks
           + TC * per_step                        # gate chunk scratch
           + 2 * _vmem_bytes((Bc, H), f32))       # h, c state scratch
    if est > 60 * _MIB:
        raise ValueError(
            f"LSTM kernel VMEM estimate {est / _MIB:.1f} MiB exceeds the 64 MiB "
            "(v7x) budget; lower gates_budget_bytes, raise nsplit, or chunk the "
            "resident activations (see TODO).")
    vmem_limit = int(min(64 * _MIB, max(32 * _MIB, est * 5 // 4)))

    return pl.pallas_call(
        _lstm_stack_kernel,
        out_shape=(jax.ShapeDtypeStruct((T, Bp, H), f32),
                   jax.ShapeDtypeStruct((L, Bp, H), f32),
                   jax.ShapeDtypeStruct((L, Bp, H), f32)),
        grid_spec=pltpu.PrefetchScalarGridSpec(
            num_scalar_prefetch=0,
            grid=(nsplit, L),
            in_specs=[
                pl.BlockSpec((T, Bc, E), lambda p, l: (0, p, 0)),   # layer-0 input
                pl.BlockSpec((E, G), lambda p, l: (0, 0)),          # W_ih layer 0
                pl.BlockSpec((1, G), lambda p, l: (0, 0)),          # bias layer 0
                pl.BlockSpec((1, H, G),                             # W_ih layers>0
                             lambda p, l: (jnp.maximum(l - 1, 0), 0, 0)),
                pl.BlockSpec((1, H, G), lambda p, l: (l, 0, 0)),    # W_hh
                pl.BlockSpec((1, 1, G),                             # bias layers>0
                             lambda p, l: (jnp.maximum(l - 1, 0), 0, 0)),
                pl.BlockSpec((1, Bc, H), lambda p, l: (l, p, 0)),   # h0
                pl.BlockSpec((1, Bc, H), lambda p, l: (l, p, 0)),   # c0
            ],
            out_specs=(
                pl.BlockSpec((T, Bc, H), lambda p, l: (0, p, 0)),   # VMEM-resident y
                pl.BlockSpec((1, Bc, H), lambda p, l: (l, p, 0)),   # h_n
                pl.BlockSpec((1, Bc, H), lambda p, l: (l, p, 0)),   # c_n
            ),
            scratch_shapes=[pltpu.VMEM((TC * Bc, G), f32),          # gate chunk
                            pltpu.VMEM((Bc, H), f32),               # h state
                            pltpu.VMEM((Bc, H), f32)],              # c state
        ),
        compiler_params=pltpu.CompilerParams(
            dimension_semantics=("parallel", "arbitrary"),  # batch split || layers
            vmem_limit_bytes=vmem_limit),
    )(x_tm, w_ih0, b0, w_ih_rest, w_hh, b_rest, h0, c0)


# ---------------------------------------------------------------------------
# Output projection: whole (M, K) activation slab resident, tile only N,
# so the (H, V) weight (dominant HBM traffic) is streamed exactly once.
# ---------------------------------------------------------------------------
def _linear_kernel(x_ref, w_ref, b_ref, o_ref):
    o_ref[...] = (jnp.dot(x_ref[...].astype(w_ref.dtype), w_ref[...],
                          preferred_element_type=jnp.float32)
                  + b_ref[...]).astype(o_ref.dtype)


def linear(x, w, b, *, tn_cap=2048, vmem_budget_bytes=48 * _MIB):
    M, K = x.shape
    Kw, N = w.shape
    assert K == Kw and (N <= 128 or N % 128 == 0)

    def est(tn):
        return (2 * _vmem_bytes((M, K), x.dtype)
                + 2 * _vmem_bytes((K, tn), w.dtype)
                + 2 * _vmem_bytes((1, tn), b.dtype)
                + 2 * _vmem_bytes((M, tn), jnp.float32))

    if N <= 128:
        TN = N
    else:
        TN = 128
        t = 128
        while t <= min(tn_cap, N):
            if N % t == 0 and est(t) <= vmem_budget_bytes:
                TN = t
            t += 128
    e = est(TN)
    if e > 60 * _MIB:
        raise ValueError(
            f"linear kernel VMEM estimate {e / _MIB:.1f} MiB too large; "
            "the B*T activation slab must be tiled along M as well.")
    vmem_limit = int(min(64 * _MIB, max(32 * _MIB, e * 5 // 4)))

    return pl.pallas_call(
        _linear_kernel,
        out_shape=jax.ShapeDtypeStruct((M, N), jnp.float32),
        grid=(N // TN,),
        in_specs=[pl.BlockSpec((M, K), lambda j: (0, 0)),   # resident activations
                  pl.BlockSpec((K, TN), lambda j: (0, j)),  # streamed weight tiles
                  pl.BlockSpec((1, TN), lambda j: (0, j))],
        out_specs=pl.BlockSpec((M, TN), lambda j: (0, j)),
        compiler_params=pltpu.CompilerParams(
            dimension_semantics=("parallel",),
            vmem_limit_bytes=vmem_limit),
    )(x, w, b)


# ---------------------------------------------------------------------------
# Parameter init (PyTorch layouts) + one-time packing for the kernels
# ---------------------------------------------------------------------------
def init_params(key, n_word, embedding_size, hidden_size, num_layers):
    keys = iter(jax.random.split(key, 4 * num_layers + 4))
    params = {"embedding": jax.random.normal(next(keys),
                                             (n_word, embedding_size),
                                             dtype=jnp.float32)}
    k = 1.0 / jnp.sqrt(hidden_size)
    for l in range(num_layers):
        in_sz = embedding_size if l == 0 else hidden_size
        params[f"w_ih_{l}"] = jax.random.uniform(
            next(keys), (4 * hidden_size, in_sz), jnp.float32, -k, k)
        params[f"w_hh_{l}"] = jax.random.uniform(
            next(keys), (4 * hidden_size, hidden_size), jnp.float32, -k, k)
        params[f"b_ih_{l}"] = jax.random.uniform(
            next(keys), (4 * hidden_size,), jnp.float32, -k, k)
        params[f"b_hh_{l}"] = jax.random.uniform(
            next(keys), (4 * hidden_size,), jnp.float32, -k, k)
    params["w_out"] = jax.random.uniform(
        next(keys), (n_word, hidden_size), jnp.float32, -k, k)
    params["b_out"] = jax.random.uniform(
        next(keys), (n_word,), jnp.float32, -k, k)
    return params


def pack_params(params, num_layers, hidden_size, *, weight_dtype=jnp.float32):
    """One-time packing: transpose, fold b_ih+b_hh, permute gates PyTorch
    i|f|g|o -> i|f|o|g (one sigmoid + one tanh per step), pad vocab to a
    multiple of 128 lanes.  weight_dtype=bf16 is the recommended production
    setting (f32 accumulation is kept either way)."""
    H = hidden_size
    perm = jnp.concatenate([jnp.arange(0, 2 * H),        # i, f
                            jnp.arange(3 * H, 4 * H),    # o
                            jnp.arange(2 * H, 3 * H)])   # g

    def pack_w(w):      # (4H, in) -> (in, 4H), gate-permuted
        return w.T[:, perm]

    def pack_b(l):
        return (params[f"b_ih_{l}"] + params[f"b_hh_{l}"])[perm][None, :]

    packed = {"embedding": params["embedding"]}
    packed["w_ih0"] = pack_w(params["w_ih_0"]).astype(weight_dtype)      # (E, 4H)
    packed["b0"] = pack_b(0).astype(jnp.float32)                         # (1, 4H)

    if num_layers > 1:        # layers 1..L-1 only: no dead zero slot for layer 0
        wih_rest = [pack_w(params[f"w_ih_{l}"]) for l in range(1, num_layers)]
        b_rest = [pack_b(l) for l in range(1, num_layers)]
    else:                      # keep the stacked arrays non-empty when L == 1
        wih_rest = [jnp.zeros((H, 4 * H), jnp.float32)]
        b_rest = [jnp.zeros((1, 4 * H), jnp.float32)]
    packed["w_ih_rest"] = jnp.stack(wih_rest).astype(weight_dtype)       # (L-1,H,4H)
    packed["b_rest"] = jnp.stack(b_rest).astype(jnp.float32)             # (L-1,1,4H)
    packed["w_hh"] = jnp.stack(
        [pack_w(params[f"w_hh_{l}"]) for l in range(num_layers)]
    ).astype(weight_dtype)                                               # (L, H, 4H)

    V = params["w_out"].shape[0]
    Vpad = max(128, _round_up(V, 128))
    packed["w_out"] = jnp.pad(params["w_out"].T,
                              ((0, 0), (0, Vpad - V))).astype(weight_dtype)
    packed["b_out"] = jnp.pad(params["b_out"][None, :],
                              ((0, 0), (0, Vpad - V))).astype(jnp.float32)
    return packed


def init_hidden(num_layers, batch_size, hidden_size):
    shape = (num_layers, batch_size, hidden_size)        # direction = 1
    return (jnp.zeros(shape, jnp.float32), jnp.zeros(shape, jnp.float32))


# ---------------------------------------------------------------------------
# Forward pass (inference: both Dropout(0.1) modules are identity)
# ---------------------------------------------------------------------------
def forward(packed, x, prev_state, *, n_word, nsplit=1):
    h0, c0 = prev_state                                   # (L, B, H)
    B, T = x.shape
    L, _, H = h0.shape

    # pad batch to a multiple of 8 per core -> full-sublane per-step accesses
    unit = 8 * nsplit
    Bp = _round_up(B, unit)

    # embedding gathered directly in time-major order: (T, B, E)
    emb = jnp.take(packed["embedding"], x.T, axis=0).astype(jnp.float32)
    if Bp != B:
        pad = ((0, 0), (0, Bp - B), (0, 0))
        emb = jnp.pad(emb, pad)
        h0 = jnp.pad(h0, pad)
        c0 = jnp.pad(c0, pad)

    y_tm, hT, cT = lstm_stack(emb, packed["w_ih0"], packed["b0"],
                              packed["w_ih_rest"], packed["w_hh"],
                              packed["b_rest"], h0, c0, nsplit=nsplit)

    # Match PyTorch batch_first `lstm_out.reshape(-1, H)` row order (b-major).
    # TODO(synk): emit (B, T, H) from the kernel epilogue to drop this transpose.
    flat = jnp.transpose(y_tm, (1, 0, 2))[:B].reshape(B * T, H)

    logits = linear(flat, packed["w_out"], packed["b_out"])[:, :n_word]
    return logits, (hT[:, :B], cT[:, :B])


# ---------------------------------------------------------------------------
# Pure-JAX reference (for numerical sanity check)
# ---------------------------------------------------------------------------
def forward_ref(params, x, prev_state, *, hidden_size, num_layers):
    hp = jax.lax.Precision.HIGHEST
    h0_all, c0_all = prev_state
    embed = jnp.take(params["embedding"], x, axis=0)
    inp = jnp.transpose(embed, (1, 0, 2)).astype(jnp.float32)
    H = hidden_size
    h_fin, c_fin = [], []
    for l in range(num_layers):
        w_ih = params[f"w_ih_{l}"].T
        w_hh = params[f"w_hh_{l}"].T
        b = params[f"b_ih_{l}"] + params[f"b_hh_{l}"]

        def step(carry, x_t, w_ih=w_ih, w_hh=w_hh, b=b):
            h, c = carry
            g = (jnp.dot(x_t, w_ih, precision=hp)
                 + jnp.dot(h, w_hh, precision=hp) + b)
            i = jax.nn.sigmoid(g[:, 0 * H:1 * H])
            f = jax.nn.sigmoid(g[:, 1 * H:2 * H])
            gg = jnp.tanh(g[:, 2 * H:3 * H])
            o = jax.nn.sigmoid(g[:, 3 * H:4 * H])
            c_new = f * c + i * gg
            h_new = o * jnp.tanh(c_new)
            return (h_new, c_new), h_new

        (hT, cT), ys = jax.lax.scan(step, (h0_all[l], c0_all[l]), inp)
        h_fin.append(hT)
        c_fin.append(cT)
        inp = ys
    lstm_out = jnp.transpose(inp, (1, 0, 2))
    flat = lstm_out.reshape(-1, hidden_size)
    logits = jnp.dot(flat, params["w_out"].T, precision=hp) + params["b_out"]
    return logits, (jnp.stack(h_fin), jnp.stack(c_fin))


# ---------------------------------------------------------------------------
if __name__ == "__main__":
    n_word = 64
    seq_size = 8
    embedding_size = 16
    hidden_size = 32
    num_layers = 2
    batch = 2

    key = jax.random.PRNGKey(0)
    k_params, k_tok = jax.random.split(key)
    params = init_params(k_params, n_word, embedding_size, hidden_size,
                         num_layers)
    x = jax.random.randint(k_tok, (batch, seq_size), 0, n_word, dtype=jnp.int32)
    prev_state = init_hidden(num_layers, batch, hidden_size)

    fwd = jax.jit(forward, static_argnames=("n_word", "nsplit"))

    # --- f32 weights: tight numerical check against the f32 reference ---
    packed_f32 = pack_params(params, num_layers, hidden_size,
                             weight_dtype=jnp.float32)
    logits, (hN, cN) = fwd(packed_f32, x, prev_state, n_word=n_word, nsplit=1)
    jax.block_until_ready((logits, hN, cN))

    assert logits.shape == (batch * seq_size, n_word)
    assert hN.shape == (num_layers, batch, hidden_size)
    assert cN.shape == (num_layers, batch, hidden_size)

    ref_logits, (ref_h, ref_c) = forward_ref(
        params, x, prev_state, hidden_size=hidden_size, num_layers=num_layers)
    assert jnp.allclose(logits, ref_logits, atol=1e-2, rtol=1e-2), "logit mismatch"
    assert jnp.allclose(hN, ref_h, atol=1e-2, rtol=1e-2), "h_n mismatch"
    assert jnp.allclose(cN, ref_c, atol=1e-2, rtol=1e-2), "c_n mismatch"

    # --- production config: bf16 weights + batch split over 2 cores (v7x) ---
    packed_bf16 = pack_params(params, num_layers, hidden_size,
                              weight_dtype=jnp.bfloat16)
    logits_bf, (h_bf, c_bf) = fwd(packed_bf16, x, prev_state, n_word=n_word,
                                  nsplit=2)
    jax.block_until_ready((logits_bf, h_bf, c_bf))
    assert logits_bf.shape == (batch * seq_size, n_word)
    assert bool(jnp.all(jnp.isfinite(logits_bf)))
    assert float(jnp.max(jnp.abs(logits_bf - logits))) < 0.5, "bf16 path diverged"

    print("KERNEL_OK")
</pallas_src>

<mosaic_0001>
module attributes {stable_mosaic.version = 11 : i64} {
  func.func @_linear_kernel(%arg0: i32, %arg1: memref<16x32xf32, #tpu.memory_space<vmem>>, %arg2: memref<32x128xf32, #tpu.memory_space<vmem>>, %arg3: memref<1x128xf32, #tpu.memory_space<vmem>>, %arg4: memref<16x128xf32, #tpu.memory_space<vmem>>) attributes {dimension_semantics = [#tpu.dimension_semantics<parallel>], iteration_bounds = array<i64: 1>, scalar_prefetch = 0 : i64, scratch_operands = 0 : i64, tpu.core_type = #tpu.core_type<tc>, window_params = [{pipeline_mode = #tpu.pipeline_mode<synchronous>, transform_indices = @transform_0, window_bounds = array<i64: 16, 32>}, {transform_indices = @transform_1, window_bounds = array<i64: 32, 128>}, {transform_indices = @transform_2, window_bounds = array<i64: 1, 128>}, {transform_indices = @transform_3, window_bounds = array<i64: 16, 128>}]} {
    %c0 = arith.constant 0 : index
    %c0_0 = arith.constant 0 : index
    %0 = vector.load %arg1[%c0, %c0_0] : memref<16x32xf32, #tpu.memory_space<vmem>>, vector<16x32xf32>
    %c0_1 = arith.constant 0 : index
    %c0_2 = arith.constant 0 : index
    %1 = vector.load %arg2[%c0_1, %c0_2] : memref<32x128xf32, #tpu.memory_space<vmem>>, vector<32x128xf32>
    %cst = arith.constant dense<0.000000e+00> : vector<16x128xf32>
    %2 = tpu.matmul %0, %1, %cst {dimension_numbers = #tpu.dot_dimension_numbers<[1], [0], [0], [1], [0, 0, 1, 1], [], []>} : vector<16x32xf32>, vector<32x128xf32>, vector<16x128xf32> -> vector<16x128xf32>
    %c0_3 = arith.constant 0 : index
    %c0_4 = arith.constant 0 : index
    %3 = vector.load %arg3[%c0_3, %c0_4] : memref<1x128xf32, #tpu.memory_space<vmem>>, vector<1x128xf32>
    %4 = vector.broadcast %3 : vector<1x128xf32> to vector<16x128xf32>
    %5 = arith.addf %2, %4 : vector<16x128xf32>
    %c0_5 = arith.constant 0 : index
    %c0_6 = arith.constant 0 : index
    %6 = vector.load %arg4[%c0_5, %c0_6] : memref<16x128xf32, #tpu.memory_space<vmem>>, vector<16x128xf32>
    tpu.vector_store %arg4[%c0_5, %c0_6], %5 {strides = array<i32>} : memref<16x128xf32, #tpu.memory_space<vmem>>, vector<16x128xf32>,
    return
  }
  func.func @transform_0(%arg0: i32) -> (i32, i32) {
    %c0_i32 = arith.constant 0 : i32
    %c0_i32_0 = arith.constant 0 : i32
    %c0_i32_1 = arith.constant 0 : i32
    return %c0_i32, %c0_i32_0 : i32, i32
  }
  func.func @transform_1(%arg0: i32) -> (i32, i32) {
    %c0_i32 = arith.constant 0 : i32
    %c0_i32_0 = arith.constant 0 : i32
    return %c0_i32, %arg0 : i32, i32
  }
  func.func @transform_2(%arg0: i32) -> (i32, i32) {
    %c0_i32 = arith.constant 0 : i32
    %c0_i32_0 = arith.constant 0 : i32
    return %c0_i32, %arg0 : i32, i32
  }
  func.func @transform_3(%arg0: i32) -> (i32, i32) {
    %c0_i32 = arith.constant 0 : i32
    %c0_i32_0 = arith.constant 0 : i32
    return %c0_i32, %arg0 : i32, i32
  }
}

module attributes {stable_mosaic.version = 11 : i64} {
  func.func @_lstm_stack_kernel(%arg0: i32, %arg1: i32, %arg2: memref<8x8x16xf32, #tpu.memory_space<vmem>>, %arg3: memref<16x128xf32, #tpu.memory_space<vmem>>, %arg4: memref<1x128xf32, #tpu.memory_space<vmem>>, %arg5: memref<1x32x128xf32, #tpu.memory_space<vmem>>, %arg6: memref<1x32x128xf32, #tpu.memory_space<vmem>>, %arg7: memref<1x1x128xf32, #tpu.memory_space<vmem>>, %arg8: memref<1x8x32xf32, #tpu.memory_space<vmem>>, %arg9: memref<1x8x32xf32, #tpu.memory_space<vmem>>, %arg10: memref<8x8x32xf32, #tpu.memory_space<vmem>>, %arg11: memref<1x8x32xf32, #tpu.memory_space<vmem>>, %arg12: memref<1x8x32xf32, #tpu.memory_space<vmem>>, %arg13: memref<64x128xf32, #tpu.memory_space<vmem>>, %arg14: memref<8x32xf32, #tpu.memory_space<vmem>>, %arg15: memref<8x32xf32, #tpu.memory_space<vmem>>) attributes {dimension_semantics = [#tpu.dimension_semantics<parallel>, #tpu.dimension_semantics<arbitrary>], iteration_bounds = array<i64: 1, 2>, scalar_prefetch = 0 : i64, scratch_operands = 3 : i64, tpu.core_type = #tpu.core_type<tc>, window_params = [{transform_indices = @transform_0, window_bounds = array<i64: 8, 8, 16>}, {pipeline_mode = #tpu.pipeline_mode<synchronous>, transform_indices = @transform_1, window_bounds = array<i64: 16, 128>}, {pipeline_mode = #tpu.pipeline_mode<synchronous>, transform_indices = @transform_2, window_bounds = array<i64: 1, 128>}, {transform_indices = @transform_3, window_bounds = array<i64: 1, 32, 128>}, {transform_indices = @transform_4, window_bounds = array<i64: 1, 32, 128>}, {transform_indices = @transform_5, window_bounds = array<i64: 1, 1, 128>}, {transform_indices = @transform_6, window_bounds = array<i64: 1, 8, 32>}, {transform_indices = @transform_7, window_bounds = array<i64: 1, 8, 32>}, {transform_indices = @transform_8, window_bounds = array<i64: 8, 8, 32>}, {transform_indices = @transform_9, window_bounds = array<i64: 1, 8, 32>}, {transform_indices = @transform_10, window_bounds = array<i64: 1, 8, 32>}]} {
    %c0 = arith.constant 0 : index
    %c0_0 = arith.constant 0 : index
    %c0_1 = arith.constant 0 : index
    %0 = vector.load %arg8[%c0, %c0_0, %c0_1] : memref<1x8x32xf32, #tpu.memory_space<vmem>>, vector<1x8x32xf32>
    %1 = vector.shape_cast %0 : vector<1x8x32xf32> to vector<8x32xf32>
    %c0_2 = arith.constant 0 : index
    %c0_3 = arith.constant 0 : index
    %2 = vector.load %arg14[%c0_2, %c0_3] : memref<8x32xf32, #tpu.memory_space<vmem>>, vector<8x32xf32>
    tpu.vector_store %arg14[%c0_2, %c0_3], %1 {strides = array<i32>} : memref<8x32xf32, #tpu.memory_space<vmem>>, vector<8x32xf32>,
    %c0_4 = arith.constant 0 : index
    %c0_5 = arith.constant 0 : index
    %c0_6 = arith.constant 0 : index
    %3 = vector.load %arg9[%c0_4, %c0_5, %c0_6] : memref<1x8x32xf32, #tpu.memory_space<vmem>>, vector<1x8x32xf32>
    %4 = vector.shape_cast %3 : vector<1x8x32xf32> to vector<8x32xf32>
    %c0_7 = arith.constant 0 : index
    %c0_8 = arith.constant 0 : index
    %5 = vector.load %arg15[%c0_7, %c0_8] : memref<8x32xf32, #tpu.memory_space<vmem>>, vector<8x32xf32>
    tpu.vector_store %arg15[%c0_7, %c0_8], %4 {strides = array<i32>} : memref<8x32xf32, #tpu.memory_space<vmem>>, vector<8x32xf32>,
    %c0_i32 = arith.constant 0 : i32
    %c8_i32 = arith.constant 8 : i32
    %6 = arith.muli %c0_i32, %c8_i32 : i32
    %7 = tpu.assume_multiple %6, 8 : i32
    %c0_i32_9 = arith.constant 0 : i32
    %8 = arith.cmpi eq, %arg1, %c0_i32_9 : i32
    %9 = arith.extui %8 : i1 to i32
    %c0_i32_10 = arith.constant 0 : i32
    %10 = arith.cmpi ne, %9, %c0_i32_10 : i32
    scf.if %10 {
      %286 = arith.index_cast %7 : i32 to index
      %c0_161 = arith.constant 0 : index
      %c0_162 = arith.constant 0 : index
      %287 = vector.load %arg2[%286, %c0_161, %c0_162] : memref<8x8x16xf32, #tpu.memory_space<vmem>>, vector<8x8x16xf32>
      %288 = vector.shape_cast %287 : vector<8x8x16xf32> to vector<64x16xf32>
      %c0_163 = arith.constant 0 : index
      %c0_164 = arith.constant 0 : index
      %289 = vector.load %arg3[%c0_163, %c0_164] : memref<16x128xf32, #tpu.memory_space<vmem>>, vector<16x128xf32>
      %cst_165 = arith.constant dense<0.000000e+00> : vector<64x128xf32>
      %290 = tpu.matmul %288, %289, %cst_165 {dimension_numbers = #tpu.dot_dimension_numbers<[1], [0], [0], [1], [0, 0, 1, 1], [], []>} : vector<64x16xf32>, vector<16x128xf32>, vector<64x128xf32> -> vector<64x128xf32>
      %c0_166 = arith.constant 0 : index
      %c0_167 = arith.constant 0 : index
      %291 = vector.load %arg4[%c0_166, %c0_167] : memref<1x128xf32, #tpu.memory_space<vmem>>, vector<1x128xf32>
      %292 = vector.broadcast %291 : vector<1x128xf32> to vector<64x128xf32>
      %293 = arith.addf %290, %292 : vector<64x128xf32>
      %c0_168 = arith.constant 0 : index
      %c0_169 = arith.constant 0 : index
      %294 = vector.load %arg13[%c0_168, %c0_169] : memref<64x128xf32, #tpu.memory_space<vmem>>, vector<64x128xf32>
      tpu.vector_store %arg13[%c0_168, %c0_169], %293 {strides = array<i32>} : memref<64x128xf32, #tpu.memory_space<vmem>>, vector<64x128xf32>,
    } else {
    }
    %c0_i32_11 = arith.constant 0 : i32
    %11 = arith.cmpi sgt, %arg1, %c0_i32_11 : i32
    %12 = arith.extui %11 : i1 to i32
    %c0_i32_12 = arith.constant 0 : i32
    %13 = arith.cmpi ne, %12, %c0_i32_12 : i32
    scf.if %13 {
      %286 = arith.index_cast %7 : i32 to index
      %c0_161 = arith.constant 0 : index
      %c0_162 = arith.constant 0 : index
      %287 = vector.load %arg10[%286, %c0_161, %c0_162] : memref<8x8x32xf32, #tpu.memory_space<vmem>>, vector<8x8x32xf32>
      %288 = vector.shape_cast %287 : vector<8x8x32xf32> to vector<64x32xf32>
      %c0_163 = arith.constant 0 : index
      %c0_164 = arith.constant 0 : index
      %c0_165 = arith.constant 0 : index
      %289 = vector.load %arg5[%c0_163, %c0_164, %c0_165] : memref<1x32x128xf32, #tpu.memory_space<vmem>>, vector<1x32x128xf32>
      %290 = vector.shape_cast %289 : vector<1x32x128xf32> to vector<32x128xf32>
      %cst_166 = arith.constant dense<0.000000e+00> : vector<64x128xf32>
      %291 = tpu.matmul %288, %290, %cst_166 {dimension_numbers = #tpu.dot_dimension_numbers<[1], [0], [0], [1], [0, 0, 1, 1], [], []>} : vector<64x32xf32>, vector<32x128xf32>, vector<64x128xf32> -> vector<64x128xf32>
      %c0_167 = arith.constant 0 : index
      %c0_168 = arith.constant 0 : index
      %c0_169 = arith.constant 0 : index
      %292 = vector.load %arg7[%c0_167, %c0_168, %c0_169] : memref<1x1x128xf32, #tpu.memory_space<vmem>>, vector<1x1x128xf32>
      %293 = vector.shape_cast %292 : vector<1x1x128xf32> to vector<1x128xf32>
      %294 = vector.broadcast %293 : vector<1x128xf32> to vector<64x128xf32>
      %295 = arith.addf %291, %294 : vector<64x128xf32>
      %c0_170 = arith.constant 0 : index
      %c0_171 = arith.constant 0 : index
      %296 = vector.load %arg13[%c0_170, %c0_171] : memref<64x128xf32, #tpu.memory_space<vmem>>, vector<64x128xf32>
      tpu.vector_store %arg13[%c0_170, %c0_171], %295 {strides = array<i32>} : memref<64x128xf32, #tpu.memory_space<vmem>>, vector<64x128xf32>,
    } else {
    }
    %c0_i32_13 = arith.constant 0 : i32
    %c8_i32_14 = arith.constant 8 : i32
    %14 = arith.muli %c0_i32_13, %c8_i32_14 : i32
    %15 = tpu.assume_multiple %14, 8 : i32
    %16 = arith.index_cast %15 : i32 to index
    %c0_15 = arith.constant 0 : index
    %17 = vector.load %arg13[%16, %c0_15] : memref<64x128xf32, #tpu.memory_space<vmem>>, vector<8x128xf32>
    %c0_16 = arith.constant 0 : index
    %c0_17 = arith.constant 0 : index
    %18 = vector.load %arg14[%c0_16, %c0_17] : memref<8x32xf32, #tpu.memory_space<vmem>>, vector<8x32xf32>
    %c0_18 = arith.constant 0 : index
    %c0_19 = arith.constant 0 : index
    %c0_20 = arith.constant 0 : index
    %19 = vector.load %arg6[%c0_18, %c0_19, %c0_20] : memref<1x32x128xf32, #tpu.memory_space<vmem>>, vector<1x32x128xf32>
    %20 = vector.shape_cast %19 : vector<1x32x128xf32> to vector<32x128xf32>
    %cst = arith.constant dense<0.000000e+00> : vector<8x128xf32>
    %21 = tpu.matmul %18, %20, %cst {dimension_numbers = #tpu.dot_dimension_numbers<[1], [0], [0], [1], [0, 0, 1, 1], [], []>} : vector<8x32xf32>, vector<32x128xf32>, vector<8x128xf32> -> vector<8x128xf32>
    %22 = arith.addf %17, %21 : vector<8x128xf32>
    %23 = vector.extract_strided_slice %22 {offsets = [0, 0], sizes = [8, 96], strides = [1, 1]} : vector<8x128xf32> to vector<8x96xf32>
    %24 = arith.negf %23 : vector<8x96xf32>
    %25 = math.exp %24 : vector<8x96xf32>
    %cst_21 = arith.constant 1.000000e+00 : f32
    %26 = vector.broadcast %cst_21 : f32 to vector<8x96xf32>
    %27 = arith.addf %26, %25 : vector<8x96xf32>
    %28 = arith.divf %26, %27 : vector<8x96xf32>
    %29 = vector.extract_strided_slice %22 {offsets = [0, 96], sizes = [8, 32], strides = [1, 1]} : vector<8x128xf32> to vector<8x32xf32>
    %30 = math.tanh %29 : vector<8x32xf32>
    %31 = vector.extract_strided_slice %28 {offsets = [0, 0], sizes = [8, 32], strides = [1, 1]} : vector<8x96xf32> to vector<8x32xf32>
    %32 = vector.extract_strided_slice %28 {offsets = [0, 32], sizes = [8, 32], strides = [1, 1]} : vector<8x96xf32> to vector<8x32xf32>
    %33 = vector.extract_strided_slice %28 {offsets = [0, 64], sizes = [8, 32], strides = [1, 1]} : vector<8x96xf32> to vector<8x32xf32>
    %c0_22 = arith.constant 0 : index
    %c0_23 = arith.constant 0 : index
    %34 = vector.load %arg15[%c0_22, %c0_23] : memref<8x32xf32, #tpu.memory_space<vmem>>, vector<8x32xf32>
    %35 = arith.mulf %32, %34 : vector<8x32xf32>
    %36 = arith.mulf %31, %30 : vector<8x32xf32>
    %37 = arith.addf %35, %36 : vector<8x32xf32>
    %38 = math.tanh %37 : vector<8x32xf32>
    %39 = arith.mulf %33, %38 : vector<8x32xf32>
    %c0_24 = arith.constant 0 : index
    %c0_25 = arith.constant 0 : index
    %40 = vector.load %arg15[%c0_24, %c0_25] : memref<8x32xf32, #tpu.memory_space<vmem>>, vector<8x32xf32>
    tpu.vector_store %arg15[%c0_24, %c0_25], %37 {strides = array<i32>} : memref<8x32xf32, #tpu.memory_space<vmem>>, vector<8x32xf32>,
    %c0_26 = arith.constant 0 : index
    %c0_27 = arith.constant 0 : index
    %41 = vector.load %arg14[%c0_26, %c0_27] : memref<8x32xf32, #tpu.memory_space<vmem>>, vector<8x32xf32>
    tpu.vector_store %arg14[%c0_26, %c0_27], %39 {strides = array<i32>} : memref<8x32xf32, #tpu.memory_space<vmem>>, vector<8x32xf32>,
    %42 = arith.addi %7, %c0_i32_13 : i32
    %43 = arith.index_cast %42 : i32 to index
    %c0_28 = arith.constant 0 : index
    %c0_29 = arith.constant 0 : index
    %44 = vector.load %arg10[%43, %c0_28, %c0_29] : memref<8x8x32xf32, #tpu.memory_space<vmem>>, vector<1x8x32xf32>
    %45 = vector.shape_cast %44 : vector<1x8x32xf32> to vector<8x32xf32>
    %46 = vector.shape_cast %39 : vector<8x32xf32> to vector<1x8x32xf32>
    tpu.vector_store %arg10[%43, %c0_28, %c0_29], %46 {strides = array<i32>} : memref<8x8x32xf32, #tpu.memory_space<vmem>>, vector<1x8x32xf32>,
    %c1_i32 = arith.constant 1 : i32
    %c8_i32_30 = arith.constant 8 : i32
    %47 = arith.muli %c1_i32, %c8_i32_30 : i32
    %48 = tpu.assume_multiple %47, 8 : i32
    %49 = arith.index_cast %48 : i32 to index
    %c0_31 = arith.constant 0 : index
    %50 = vector.load %arg13[%49, %c0_31] : memref<64x128xf32, #tpu.memory_space<vmem>>, vector<8x128xf32>
    %c0_32 = arith.constant 0 : index
    %c0_33 = arith.constant 0 : index
    %51 = vector.load %arg14[%c0_32, %c0_33] : memref<8x32xf32, #tpu.memory_space<vmem>>, vector<8x32xf32>
    %c0_34 = arith.constant 0 : index
    %c0_35 = arith.constant 0 : index
    %c0_36 = arith.constant 0 : index
    %52 = vector.load %arg6[%c0_34, %c0_35, %c0_36] : memref<1x32x128xf32, #tpu.memory_space<vmem>>, vector<1x32x128xf32>
    %53 = vector.shape_cast %52 : vector<1x32x128xf32> to vector<32x128xf32>
    %cst_37 = arith.constant dense<0.000000e+00> : vector<8x128xf32>
    %54 = tpu.matmul %51, %53, %cst_37 {dimension_numbers = #tpu.dot_dimension_numbers<[1], [0], [0], [1], [0, 0, 1, 1], [], []>} : vector<8x32xf32>, vector<32x128xf32>, vector<8x128xf32> -> vector<8x128xf32>
    %55 = arith.addf %50, %54 : vector<8x128xf32>
    %56 = vector.extract_strided_slice %55 {offsets = [0, 0], sizes = [8, 96], strides = [1, 1]} : vector<8x128xf32> to vector<8x96xf32>
    %57 = arith.negf %56 : vector<8x96xf32>
    %58 = math.exp %57 : vector<8x96xf32>
    %cst_38 = arith.constant 1.000000e+00 : f32
    %59 = vector.broadcast %cst_38 : f32 to vector<8x96xf32>
    %60 = arith.addf %59, %58 : vector<8x96xf32>
    %61 = arith.divf %59, %60 : vector<8x96xf32>
    %62 = vector.extract_strided_slice %55 {offsets = [0, 96], sizes = [8, 32], strides = [1, 1]} : vector<8x128xf32> to vector<8x32xf32>
    %63 = math.tanh %62 : vector<8x32xf32>
    %64 = vector.extract_strided_slice %61 {offsets = [0, 0], sizes = [8, 32], strides = [1, 1]} : vector<8x96xf32> to vector<8x32xf32>
    %65 = vector.extract_strided_slice %61 {offsets = [0, 32], sizes = [8, 32], strides = [1, 1]} : vector<8x96xf32> to vector<8x32xf32>
    %66 = vector.extract_strided_slice %61 {offsets = [0, 64], sizes = [8, 32], strides = [1, 1]} : vector<8x96xf32> to vector<8x32xf32>
    %c0_39 = arith.constant 0 : index
    %c0_40 = arith.constant 0 : index
    %67 = vector.load %arg15[%c0_39, %c0_40] : memref<8x32xf32, #tpu.memory_space<vmem>>, vector<8x32xf32>
    %68 = arith.mulf %65, %67 : vector<8x32xf32>
    %69 = arith.mulf %64, %63 : vector<8x32xf32>
    %70 = arith.addf %68, %69 : vector<8x32xf32>
    %71 = math.tanh %70 : vector<8x32xf32>
    %72 = arith.mulf %66, %71 : vector<8x32xf32>
    %c0_41 = arith.constant 0 : index
    %c0_42 = arith.constant 0 : index
    %73 = vector.load %arg15[%c0_41, %c0_42] : memref<8x32xf32, #tpu.memory_space<vmem>>, vector<8x32xf32>
    tpu.vector_store %arg15[%c0_41, %c0_42], %70 {strides = array<i32>} : memref<8x32xf32, #tpu.memory_space<vmem>>, vector<8x32xf32>,
    %c0_43 = arith.constant 0 : index
    %c0_44 = arith.constant 0 : index
    %74 = vector.load %arg14[%c0_43, %c0_44] : memref<8x32xf32, #tpu.memory_space<vmem>>, vector<8x32xf32>
    tpu.vector_store %arg14[%c0_43, %c0_44], %72 {strides = array<i32>} : memref<8x32xf32, #tpu.memory_space<vmem>>, vector<8x32xf32>,
    %75 = arith.addi %7, %c1_i32 : i32
    %76 = arith.index_cast %75 : i32 to index
    %c0_45 = arith.constant 0 : index
    %c0_46 = arith.constant 0 : index
    %77 = vector.load %arg10[%76, %c0_45, %c0_46] : memref<8x8x32xf32, #tpu.memory_space<vmem>>, vector<1x8x32xf32>
    %78 = vector.shape_cast %77 : vector<1x8x32xf32> to vector<8x32xf32>
    %79 = vector.shape_cast %72 : vector<8x32xf32> to vector<1x8x32xf32>
    tpu.vector_store %arg10[%76, %c0_45, %c0_46], %79 {strides = array<i32>} : memref<8x8x32xf32, #tpu.memory_space<vmem>>, vector<1x8x32xf32>,
    %c2_i32 = arith.constant 2 : i32
    %c8_i32_47 = arith.constant 8 : i32
    %80 = arith.muli %c2_i32, %c8_i32_47 : i32
    %81 = tpu.assume_multiple %80, 8 : i32
    %82 = arith.index_cast %81 : i32 to index
    %c0_48 = arith.constant 0 : index
    %83 = vector.load %arg13[%82, %c0_48] : memref<64x128xf32, #tpu.memory_space<vmem>>, vector<8x128xf32>
    %c0_49 = arith.constant 0 : index
    %c0_50 = arith.constant 0 : index
    %84 = vector.load %arg14[%c0_49, %c0_50] : memref<8x32xf32, #tpu.memory_space<vmem>>, vector<8x32xf32>
    %c0_51 = arith.constant 0 : index
    %c0_52 = arith.constant 0 : index
    %c0_53 = arith.constant 0 : index
    %85 = vector.load %arg6[%c0_51, %c0_52, %c0_53] : memref<1x32x128xf32, #tpu.memory_space<vmem>>, vector<1x32x128xf32>
    %86 = vector.shape_cast %85 : vector<1x32x128xf32> to vector<32x128xf32>
    %cst_54 = arith.constant dense<0.000000e+00> : vector<8x128xf32>
    %87 = tpu.matmul %84, %86, %cst_54 {dimension_numbers = #tpu.dot_dimension_numbers<[1], [0], [0], [1], [0, 0, 1, 1], [], []>} : vector<8x32xf32>, vector<32x128xf32>, vector<8x128xf32> -> vector<8x128xf32>
    %88 = arith.addf %83, %87 : vector<8x128xf32>
    %89 = vector.extract_strided_slice %88 {offsets = [0, 0], sizes = [8, 96], strides = [1, 1]} : vector<8x128xf32> to vector<8x96xf32>
    %90 = arith.negf %89 : vector<8x96xf32>
    %91 = math.exp %90 : vector<8x96xf32>
    %cst_55 = arith.constant 1.000000e+00 : f32
    %92 = vector.broadcast %cst_55 : f32 to vector<8x96xf32>
    %93 = arith.addf %92, %91 : vector<8x96xf32>
    %94 = arith.divf %92, %93 : vector<8x96xf32>
    %95 = vector.extract_strided_slice %88 {offsets = [0, 96], sizes = [8, 32], strides = [1, 1]} : vector<8x128xf32> to vector<8x32xf32>
    %96 = math.tanh %95 : vector<8x32xf32>
    %97 = vector.extract_strided_slice %94 {offsets = [0, 0], sizes = [8, 32], strides = [1, 1]} : vector<8x96xf32> to vector<8x32xf32>
    %98 = vector.extract_strided_slice %94 {offsets = [0, 32], sizes = [8, 32], strides = [1, 1]} : vector<8x96xf32> to vector<8x32xf32>
    %99 = vector.extract_strided_slice %94 {offsets = [0, 64], sizes = [8, 32], strides = [1, 1]} : vector<8x96xf32> to vector<8x32xf32>
    %c0_56 = arith.constant 0 : index
    %c0_57 = arith.constant 0 : index
    %100 = vector.load %arg15[%c0_56, %c0_57] : memref<8x32xf32, #tpu.memory_space<vmem>>, vector<8x32xf32>
    %101 = arith.mulf %98, %100 : vector<8x32xf32>
    %102 = arith.mulf %97, %96 : vector<8x32xf32>
    %103 = arith.addf %101, %102 : vector<8x32xf32>
    %104 = math.tanh %103 : vector<8x32xf32>
    %105 = arith.mulf %99, %104 : vector<8x32xf32>
    %c0_58 = arith.constant 0 : index
    %c0_59 = arith.constant 0 : index
    %106 = vector.load %arg15[%c0_58, %c0_59] : memref<8x32xf32, #tpu.memory_space<vmem>>, vector<8x32xf32>
    tpu.vector_store %arg15[%c0_58, %c0_59], %103 {strides = array<i32>} : memref<8x32xf32, #tpu.memory_space<vmem>>, vector<8x32xf32>,
    %c0_60 = arith.constant 0 : index
    %c0_61 = arith.constant 0 : index
    %107 = vector.load %arg14[%c0_60, %c0_61] : memref<8x32xf32, #tpu.memory_space<vmem>>, vector<8x32xf32>
    tpu.vector_store %arg14[%c0_60, %c0_61], %105 {strides = array<i32>} : memref<8x32xf32, #tpu.memory_space<vmem>>, vector<8x32xf32>,
    %108 = arith.addi %7, %c2_i32 : i32
    %109 = arith.index_cast %108 : i32 to index
    %c0_62 = arith.constant 0 : index
    %c0_63 = arith.constant 0 : index
    %110 = vector.load %arg10[%109, %c0_62, %c0_63] : memref<8x8x32xf32, #tpu.memory_space<vmem>>, vector<1x8x32xf32>
    %111 = vector.shape_cast %110 : vector<1x8x32xf32> to vector<8x32xf32>
    %112 = vector.shape_cast %105 : vector<8x32xf32> to vector<1x8x32xf32>
    tpu.vector_store %arg10[%109, %c0_62, %c0_63], %112 {strides = array<i32>} : memref<8x8x32xf32, #tpu.memory_space<vmem>>, vector<1x8x32xf32>,
    %c3_i32 = arith.constant 3 : i32
    %c8_i32_64 = arith.constant 8 : i32
    %113 = arith.muli %c3_i32, %c8_i32_64 : i32
    %114 = tpu.assume_multiple %113, 8 : i32
    %115 = arith.index_cast %114 : i32 to index
    %c0_65 = arith.constant 0 : index
    %116 = vector.load %arg13[%115, %c0_65] : memref<64x128xf32, #tpu.memory_space<vmem>>, vector<8x128xf32>
    %c0_66 = arith.constant 0 : index
    %c0_67 = arith.constant 0 : index
    %117 = vector.load %arg14[%c0_66, %c0_67] : memref<8x32xf32, #tpu.memory_space<vmem>>, vector<8x32xf32>
    %c0_68 = arith.constant 0 : index
    %c0_69 = arith.constant 0 : index
    %c0_70 = arith.constant 0 : index
    %118 = vector.load %arg6[%c0_68, %c0_69, %c0_70] : memref<1x32x128xf32, #tpu.memory_space<vmem>>, vector<1x32x128xf32>
    %119 = vector.shape_cast %118 : vector<1x32x128xf32> to vector<32x128xf32>
    %cst_71 = arith.constant dense<0.000000e+00> : vector<8x128xf32>
    %120 = tpu.matmul %117, %119, %cst_71 {dimension_numbers = #tpu.dot_dimension_numbers<[1], [0], [0], [1], [0, 0, 1, 1], [], []>} : vector<8x32xf32>, vector<32x128xf32>, vector<8x128xf32> -> vector<8x128xf32>
    %121 = arith.addf %116, %120 : vector<8x128xf32>
    %122 = vector.extract_strided_slice %121 {offsets = [0, 0], sizes = [8, 96], strides = [1, 1]} : vector<8x128xf32> to vector<8x96xf32>
    %123 = arith.negf %122 : vector<8x96xf32>
    %124 = math.exp %123 : vector<8x96xf32>
    %cst_72 = arith.constant 1.000000e+00 : f32
    %125 = vector.broadcast %cst_72 : f32 to vector<8x96xf32>
    %126 = arith.addf %125, %124 : vector<8x96xf32>
    %127 = arith.divf %125, %126 : vector<8x96xf32>
    %128 = vector.extract_strided_slice %121 {offsets = [0, 96], sizes = [8, 32], strides = [1, 1]} : vector<8x128xf32> to vector<8x32xf32>
    %129 = math.tanh %128 : vector<8x32xf32>
    %130 = vector.extract_strided_slice %127 {offsets = [0, 0], sizes = [8, 32], strides = [1, 1]} : vector<8x96xf32> to vector<8x32xf32>
    %131 = vector.extract_strided_slice %127 {offsets = [0, 32], sizes = [8, 32], strides = [1, 1]} : vector<8x96xf32> to vector<8x32xf32>
    %132 = vector.extract_strided_slice %127 {offsets = [0, 64], sizes = [8, 32], strides = [1, 1]} : vector<8x96xf32> to vector<8x32xf32>
    %c0_73 = arith.constant 0 : index
    %c0_74 = arith.constant 0 : index
    %133 = vector.load %arg15[%c0_73, %c0_74] : memref<8x32xf32, #tpu.memory_space<vmem>>, vector<8x32xf32>
    %134 = arith.mulf %131, %133 : vector<8x32xf32>
    %135 = arith.mulf %130, %129 : vector<8x32xf32>
    %136 = arith.addf %134, %135 : vector<8x32xf32>
    %137 = math.tanh %136 : vector<8x32xf32>
    %138 = arith.mulf %132, %137 : vector<8x32xf32>
    %c0_75 = arith.constant 0 : index
    %c0_76 = arith.constant 0 : index
    %139 = vector.load %arg15[%c0_75, %c0_76] : memref<8x32xf32, #tpu.memory_space<vmem>>, vector<8x32xf32>
    tpu.vector_store %arg15[%c0_75, %c0_76], %136 {strides = array<i32>} : memref<8x32xf32, #tpu.memory_space<vmem>>, vector<8x32xf32>,
    %c0_77 = arith.constant 0 : index
    %c0_78 = arith.constant 0 : index
    %140 = vector.load %arg14[%c0_77, %c0_78] : memref<8x32xf32, #tpu.memory_space<vmem>>, vector<8x32xf32>
    tpu.vector_store %arg14[%c0_77, %c0_78], %138 {strides = array<i32>} : memref<8x32xf32, #tpu.memory_space<vmem>>, vector<8x32xf32>,
    %141 = arith.addi %7, %c3_i32 : i32
    %142 = arith.index_cast %141 : i32 to index
    %c0_79 = arith.constant 0 : index
    %c0_80 = arith.constant 0 : index
    %143 = vector.load %arg10[%142, %c0_79, %c0_80] : memref<8x8x32xf32, #tpu.memory_space<vmem>>, vector<1x8x32xf32>
    %144 = vector.shape_cast %143 : vector<1x8x32xf32> to vector<8x32xf32>
    %145 = vector.shape_cast %138 : vector<8x32xf32> to vector<1x8x32xf32>
    tpu.vector_store %arg10[%142, %c0_79, %c0_80], %145 {strides = array<i32>} : memref<8x8x32xf32, #tpu.memory_space<vmem>>, vector<1x8x32xf32>,
    %c4_i32 = arith.constant 4 : i32
    %c8_i32_81 = arith.constant 8 : i32
    %146 = arith.muli %c4_i32, %c8_i32_81 : i32
    %147 = tpu.assume_multiple %146, 8 : i32
    %148 = arith.index_cast %147 : i32 to index
    %c0_82 = arith.constant 0 : index
    %149 = vector.load %arg13[%148, %c0_82] : memref<64x128xf32, #tpu.memory_space<vmem>>, vector<8x128xf32>
    %c0_83 = arith.constant 0 : index
    %c0_84 = arith.constant 0 : index
    %150 = vector.load %arg14[%c0_83, %c0_84] : memref<8x32xf32, #tpu.memory_space<vmem>>, vector<8x32xf32>
    %c0_85 = arith.constant 0 : index
    %c0_86 = arith.constant 0 : index
    %c0_87 = arith.constant 0 : index
    %151 = vector.load %arg6[%c0_85, %c0_86, %c0_87] : memref<1x32x128xf32, #tpu.memory_space<vmem>>, vector<1x32x128xf32>
    %152 = vector.shape_cast %151 : vector<1x32x128xf32> to vector<32x128xf32>
    %cst_88 = arith.constant dense<0.000000e+00> : vector<8x128xf32>
    %153 = tpu.matmul %150, %152, %cst_88 {dimension_numbers = #tpu.dot_dimension_numbers<[1], [0], [0], [1], [0, 0, 1, 1], [], []>} : vector<8x32xf32>, vector<32x128xf32>, vector<8x128xf32> -> vector<8x128xf32>
    %154 = arith.addf %149, %153 : vector<8x128xf32>
    %155 = vector.extract_strided_slice %154 {offsets = [0, 0], sizes = [8, 96], strides = [1, 1]} : vector<8x128xf32> to vector<8x96xf32>
    %156 = arith.negf %155 : vector<8x96xf32>
    %157 = math.exp %156 : vector<8x96xf32>
    %cst_89 = arith.constant 1.000000e+00 : f32
    %158 = vector.broadcast %cst_89 : f32 to vector<8x96xf32>
    %159 = arith.addf %158, %157 : vector<8x96xf32>
    %160 = arith.divf %158, %159 : vector<8x96xf32>
    %161 = vector.extract_strided_slice %154 {offsets = [0, 96], sizes = [8, 32], strides = [1, 1]} : vector<8x128xf32> to vector<8x32xf32>
    %162 = math.tanh %161 : vector<8x32xf32>
    %163 = vector.extract_strided_slice %160 {offsets = [0, 0], sizes = [8, 32], strides = [1, 1]} : vector<8x96xf32> to vector<8x32xf32>
    %164 = vector.extract_strided_slice %160 {offsets = [0, 32], sizes = [8, 32], strides = [1, 1]} : vector<8x96xf32> to vector<8x32xf32>
    %165 = vector.extract_strided_slice %160 {offsets = [0, 64], sizes = [8, 32], strides = [1, 1]} : vector<8x96xf32> to vector<8x32xf32>
    %c0_90 = arith.constant 0 : index
    %c0_91 = arith.constant 0 : index
    %166 = vector.load %arg15[%c0_90, %c0_91] : memref<8x32xf32, #tpu.memory_space<vmem>>, vector<8x32xf32>
    %167 = arith.mulf %164, %166 : vector<8x32xf32>
    %168 = arith.mulf %163, %162 : vector<8x32xf32>
    %169 = arith.addf %167, %168 : vector<8x32xf32>
    %170 = math.tanh %169 : vector<8x32xf32>
    %171 = arith.mulf %165, %170 : vector<8x32xf32>
    %c0_92 = arith.constant 0 : index
    %c0_93 = arith.constant 0 : index
    %172 = vector.load %arg15[%c0_92, %c0_93] : memref<8x32xf32, #tpu.memory_space<vmem>>, vector<8x32xf32>
    tpu.vector_store %arg15[%c0_92, %c0_93], %169 {strides = array<i32>} : memref<8x32xf32, #tpu.memory_space<vmem>>, vector<8x32xf32>,
    %c0_94 = arith.constant 0 : index
    %c0_95 = arith.constant 0 : index
    %173 = vector.load %arg14[%c0_94, %c0_95] : memref<8x32xf32, #tpu.memory_space<vmem>>, vector<8x32xf32>
    tpu.vector_store %arg14[%c0_94, %c0_95], %171 {strides = array<i32>} : memref<8x32xf32, #tpu.memory_space<vmem>>, vector<8x32xf32>,
    %174 = arith.addi %7, %c4_i32 : i32
    %175 = arith.index_cast %174 : i32 to index
    %c0_96 = arith.constant 0 : index
    %c0_97 = arith.constant 0 : index
    %176 = vector.load %arg10[%175, %c0_96, %c0_97] : memref<8x8x32xf32, #tpu.memory_space<vmem>>, vector<1x8x32xf32>
    %177 = vector.shape_cast %176 : vector<1x8x32xf32> to vector<8x32xf32>
    %178 = vector.shape_cast %171 : vector<8x32xf32> to vector<1x8x32xf32>
    tpu.vector_store %arg10[%175, %c0_96, %c0_97], %178 {strides = array<i32>} : memref<8x8x32xf32, #tpu.memory_space<vmem>>, vector<1x8x32xf32>,
    %c5_i32 = arith.constant 5 : i32
    %c8_i32_98 = arith.constant 8 : i32
    %179 = arith.muli %c5_i32, %c8_i32_98 : i32
    %180 = tpu.assume_multiple %179, 8 : i32
    %181 = arith.index_cast %180 : i32 to index
    %c0_99 = arith.constant 0 : index
    %182 = vector.load %arg13[%181, %c0_99] : memref<64x128xf32, #tpu.memory_space<vmem>>, vector<8x128xf32>
    %c0_100 = arith.constant 0 : index
    %c0_101 = arith.constant 0 : index
    %183 = vector.load %arg14[%c0_100, %c0_101] : memref<8x32xf32, #tpu.memory_space<vmem>>, vector<8x32xf32>
    %c0_102 = arith.constant 0 : index
    %c0_103 = arith.constant 0 : index
    %c0_104 = arith.constant 0 : index
    %184 = vector.load %arg6[%c0_102, %c0_103, %c0_104] : memref<1x32x128xf32, #tpu.memory_space<vmem>>, vector<1x32x128xf32>
    %185 = vector.shape_cast %184 : vector<1x32x128xf32> to vector<32x128xf32>
    %cst_105 = arith.constant dense<0.000000e+00> : vector<8x128xf32>
    %186 = tpu.matmul %183, %185, %cst_105 {dimension_numbers = #tpu.dot_dimension_numbers<[1], [0], [0], [1], [0, 0, 1, 1], [], []>} : vector<8x32xf32>, vector<32x128xf32>, vector<8x128xf32> -> vector<8x128xf32>
    %187 = arith.addf %182, %186 : vector<8x128xf32>
    %188 = vector.extract_strided_slice %187 {offsets = [0, 0], sizes = [8, 96], strides = [1, 1]} : vector<8x128xf32> to vector<8x96xf32>
    %189 = arith.negf %188 : vector<8x96xf32>
    %190 = math.exp %189 : vector<8x96xf32>
    %cst_106 = arith.constant 1.000000e+00 : f32
    %191 = vector.broadcast %cst_106 : f32 to vector<8x96xf32>
    %192 = arith.addf %191, %190 : vector<8x96xf32>
    %193 = arith.divf %191, %192 : vector<8x96xf32>
    %194 = vector.extract_strided_slice %187 {offsets = [0, 96], sizes = [8, 32], strides = [1, 1]} : vector<8x128xf32> to vector<8x32xf32>
    %195 = math.tanh %194 : vector<8x32xf32>
    %196 = vector.extract_strided_slice %193 {offsets = [0, 0], sizes = [8, 32], strides = [1, 1]} : vector<8x96xf32> to vector<8x32xf32>
    %197 = vector.extract_strided_slice %193 {offsets = [0, 32], sizes = [8, 32], strides = [1, 1]} : vector<8x96xf32> to vector<8x32xf32>
    %198 = vector.extract_strided_slice %193 {offsets = [0, 64], sizes = [8, 32], strides = [1, 1]} : vector<8x96xf32> to vector<8x32xf32>
    %c0_107 = arith.constant 0 : index
    %c0_108 = arith.constant 0 : index
    %199 = vector.load %arg15[%c0_107, %c0_108] : memref<8x32xf32, #tpu.memory_space<vmem>>, vector<8x32xf32>
    %200 = arith.mulf %197, %199 : vector<8x32xf32>
    %201 = arith.mulf %196, %195 : vector<8x32xf32>
    %202 = arith.addf %200, %201 : vector<8x32xf32>
    %203 = math.tanh %202 : vector<8x32xf32>
    %204 = arith.mulf %198, %203 : vector<8x32xf32>
    %c0_109 = arith.constant 0 : index
    %c0_110 = arith.constant 0 : index
    %205 = vector.load %arg15[%c0_109, %c0_110] : memref<8x32xf32, #tpu.memory_space<vmem>>, vector<8x32xf32>
    tpu.vector_store %arg15[%c0_109, %c0_110], %202 {strides = array<i32>} : memref<8x32xf32, #tpu.memory_space<vmem>>, vector<8x32xf32>,
    %c0_111 = arith.constant 0 : index
    %c0_112 = arith.constant 0 : index
    %206 = vector.load %arg14[%c0_111, %c0_112] : memref<8x32xf32, #tpu.memory_space<vmem>>, vector<8x32xf32>
    tpu.vector_store %arg14[%c0_111, %c0_112], %204 {strides = array<i32>} : memref<8x32xf32, #tpu.memory_space<vmem>>, vector<8x32xf32>,
    %207 = arith.addi %7, %c5_i32 : i32
    %208 = arith.index_cast %207 : i32 to index
    %c0_113 = arith.constant 0 : index
    %c0_114 = arith.constant 0 : index
    %209 = vector.load %arg10[%208, %c0_113, %c0_114] : memref<8x8x32xf32, #tpu.memory_space<vmem>>, vector<1x8x32xf32>
    %210 = vector.shape_cast %209 : vector<1x8x32xf32> to vector<8x32xf32>
    %211 = vector.shape_cast %204 : vector<8x32xf32> to vector<1x8x32xf32>
    tpu.vector_store %arg10[%208, %c0_113, %c0_114], %211 {strides = array<i32>} : memref<8x8x32xf32, #tpu.memory_space<vmem>>, vector<1x8x32xf32>,
    %c6_i32 = arith.constant 6 : i32
    %c8_i32_115 = arith.constant 8 : i32
    %212 = arith.muli %c6_i32, %c8_i32_115 : i32
    %213 = tpu.assume_multiple %212, 8 : i32
    %214 = arith.index_cast %213 : i32 to index
    %c0_116 = arith.constant 0 : index
    %215 = vector.load %arg13[%214, %c0_116] : memref<64x128xf32, #tpu.memory_space<vmem>>, vector<8x128xf32>
    %c0_117 = arith.constant 0 : index
    %c0_118 = arith.constant 0 : index
    %216 = vector.load %arg14[%c0_117, %c0_118] : memref<8x32xf32, #tpu.memory_space<vmem>>, vector<8x32xf32>
    %c0_119 = arith.constant 0 : index
    %c0_120 = arith.constant 0 : index
    %c0_121 = arith.constant 0 : index
    %217 = vector.load %arg6[%c0_119, %c0_120, %c0_121] : memref<1x32x128xf32, #tpu.memory_space<vmem>>, vector<1x32x128xf32>
    %218 = vector.shape_cast %217 : vector<1x32x128xf32> to vector<32x128xf32>
    %cst_122 = arith.constant dense<0.000000e+00> : vector<8x128xf32>
    %219 = tpu.matmul %216, %218, %cst_122 {dimension_numbers = #tpu.dot_dimension_numbers<[1], [0], [0], [1], [0, 0, 1, 1], [], []>} : vector<8x32xf32>, vector<32x128xf32>, vector<8x128xf32> -> vector<8x128xf32>
    %220 = arith.addf %215, %219 : vector<8x128xf32>
    %221 = vector.extract_strided_slice %220 {offsets = [0, 0], sizes = [8, 96], strides = [1, 1]} : vector<8x128xf32> to vector<8x96xf32>
    %222 = arith.negf %221 : vector<8x96xf32>
    %223 = math.exp %222 : vector<8x96xf32>
    %cst_123 = arith.constant 1.000000e+00 : f32
    %224 = vector.broadcast %cst_123 : f32 to vector<8x96xf32>
    %225 = arith.addf %224, %223 : vector<8x96xf32>
    %226 = arith.divf %224, %225 : vector<8x96xf32>
    %227 = vector.extract_strided_slice %220 {offsets = [0, 96], sizes = [8, 32], strides = [1, 1]} : vector<8x128xf32> to vector<8x32xf32>
    %228 = math.tanh %227 : vector<8x32xf32>
    %229 = vector.extract_strided_slice %226 {offsets = [0, 0], sizes = [8, 32], strides = [1, 1]} : vector<8x96xf32> to vector<8x32xf32>
    %230 = vector.extract_strided_slice %226 {offsets = [0, 32], sizes = [8, 32], strides = [1, 1]} : vector<8x96xf32> to vector<8x32xf32>
    %231 = vector.extract_strided_slice %226 {offsets = [0, 64], sizes = [8, 32], strides = [1, 1]} : vector<8x96xf32> to vector<8x32xf32>
    %c0_124 = arith.constant 0 : index
    %c0_125 = arith.constant 0 : index
    %232 = vector.load %arg15[%c0_124, %c0_125] : memref<8x32xf32, #tpu.memory_space<vmem>>, vector<8x32xf32>
    %233 = arith.mulf %230, %232 : vector<8x32xf32>
    %234 = arith.mulf %229, %228 : vector<8x32xf32>
    %235 = arith.addf %233, %234 : vector<8x32xf32>
    %236 = math.tanh %235 : vector<8x32xf32>
    %237 = arith.mulf %231, %236 : vector<8x32xf32>
    %c0_126 = arith.constant 0 : index
    %c0_127 = arith.constant 0 : index
    %238 = vector.load %arg15[%c0_126, %c0_127] : memref<8x32xf32, #tpu.memory_space<vmem>>, vector<8x32xf32>
    tpu.vector_store %arg15[%c0_126, %c0_127], %235 {strides = array<i32>} : memref<8x32xf32, #tpu.memory_space<vmem>>, vector<8x32xf32>,
    %c0_128 = arith.constant 0 : index
    %c0_129 = arith.constant 0 : index
    %239 = vector.load %arg14[%c0_128, %c0_129] : memref<8x32xf32, #tpu.memory_space<vmem>>, vector<8x32xf32>
    tpu.vector_store %arg14[%c0_128, %c0_129], %237 {strides = array<i32>} : memref<8x32xf32, #tpu.memory_space<vmem>>, vector<8x32xf32>,
    %240 = arith.addi %7, %c6_i32 : i32
    %241 = arith.index_cast %240 : i32 to index
    %c0_130 = arith.constant 0 : index
    %c0_131 = arith.constant 0 : index
    %242 = vector.load %arg10[%241, %c0_130, %c0_131] : memref<8x8x32xf32, #tpu.memory_space<vmem>>, vector<1x8x32xf32>
    %243 = vector.shape_cast %242 : vector<1x8x32xf32> to vector<8x32xf32>
    %244 = vector.shape_cast %237 : vector<8x32xf32> to vector<1x8x32xf32>
    tpu.vector_store %arg10[%241, %c0_130, %c0_131], %244 {strides = array<i32>} : memref<8x8x32xf32, #tpu.memory_space<vmem>>, vector<1x8x32xf32>,
    %c7_i32 = arith.constant 7 : i32
    %c8_i32_132 = arith.constant 8 : i32
    %245 = arith.muli %c7_i32, %c8_i32_132 : i32
    %246 = tpu.assume_multiple %245, 8 : i32
    %247 = arith.index_cast %246 : i32 to index
    %c0_133 = arith.constant 0 : index
    %248 = vector.load %arg13[%247, %c0_133] : memref<64x128xf32, #tpu.memory_space<vmem>>, vector<8x128xf32>
    %c0_134 = arith.constant 0 : index
    %c0_135 = arith.constant 0 : index
    %249 = vector.load %arg14[%c0_134, %c0_135] : memref<8x32xf32, #tpu.memory_space<vmem>>, vector<8x32xf32>
    %c0_136 = arith.constant 0 : index
    %c0_137 = arith.constant 0 : index
    %c0_138 = arith.constant 0 : index
    %250 = vector.load %arg6[%c0_136, %c0_137, %c0_138] : memref<1x32x128xf32, #tpu.memory_space<vmem>>, vector<1x32x128xf32>
    %251 = vector.shape_cast %250 : vector<1x32x128xf32> to vector<32x128xf32>
    %cst_139 = arith.constant dense<0.000000e+00> : vector<8x128xf32>
    %252 = tpu.matmul %249, %251, %cst_139 {dimension_numbers = #tpu.dot_dimension_numbers<[1], [0], [0], [1], [0, 0, 1, 1], [], []>} : vector<8x32xf32>, vector<32x128xf32>, vector<8x128xf32> -> vector<8x128xf32>
    %253 = arith.addf %248, %252 : vector<8x128xf32>
    %254 = vector.extract_strided_slice %253 {offsets = [0, 0], sizes = [8, 96], strides = [1, 1]} : vector<8x128xf32> to vector<8x96xf32>
    %255 = arith.negf %254 : vector<8x96xf32>
    %256 = math.exp %255 : vector<8x96xf32>
    %cst_140 = arith.constant 1.000000e+00 : f32
    %257 = vector.broadcast %cst_140 : f32 to vector<8x96xf32>
    %258 = arith.addf %257, %256 : vector<8x96xf32>
    %259 = arith.divf %257, %258 : vector<8x96xf32>
    %260 = vector.extract_strided_slice %253 {offsets = [0, 96], sizes = [8, 32], strides = [1, 1]} : vector<8x128xf32> to vector<8x32xf32>
    %261 = math.tanh %260 : vector<8x32xf32>
    %262 = vector.extract_strided_slice %259 {offsets = [0, 0], sizes = [8, 32], strides = [1, 1]} : vector<8x96xf32> to vector<8x32xf32>
    %263 = vector.extract_strided_slice %259 {offsets = [0, 32], sizes = [8, 32], strides = [1, 1]} : vector<8x96xf32> to vector<8x32xf32>
    %264 = vector.extract_strided_slice %259 {offsets = [0, 64], sizes = [8, 32], strides = [1, 1]} : vector<8x96xf32> to vector<8x32xf32>
    %c0_141 = arith.constant 0 : index
    %c0_142 = arith.constant 0 : index
    %265 = vector.load %arg15[%c0_141, %c0_142] : memref<8x32xf32, #tpu.memory_space<vmem>>, vector<8x32xf32>
    %266 = arith.mulf %263, %265 : vector<8x32xf32>
    %267 = arith.mulf %262, %261 : vector<8x32xf32>
    %268 = arith.addf %266, %267 : vector<8x32xf32>
    %269 = math.tanh %268 : vector<8x32xf32>
    %270 = arith.mulf %264, %269 : vector<8x32xf32>
    %c0_143 = arith.constant 0 : index
    %c0_144 = arith.constant 0 : index
    %271 = vector.load %arg15[%c0_143, %c0_144] : memref<8x32xf32, #tpu.memory_space<vmem>>, vector<8x32xf32>
    tpu.vector_store %arg15[%c0_143, %c0_144], %268 {strides = array<i32>} : memref<8x32xf32, #tpu.memory_space<vmem>>, vector<8x32xf32>,
    %c0_145 = arith.constant 0 : index
    %c0_146 = arith.constant 0 : index
    %272 = vector.load %arg14[%c0_145, %c0_146] : memref<8x32xf32, #tpu.memory_space<vmem>>, vector<8x32xf32>
    tpu.vector_store %arg14[%c0_145, %c0_146], %270 {strides = array<i32>} : memref<8x32xf32, #tpu.memory_space<vmem>>, vector<8x32xf32>,
    %273 = arith.addi %7, %c7_i32 : i32
    %274 = arith.index_cast %273 : i32 to index
    %c0_147 = arith.constant 0 : index
    %c0_148 = arith.constant 0 : index
    %275 = vector.load %arg10[%274, %c0_147, %c0_148] : memref<8x8x32xf32, #tpu.memory_space<vmem>>, vector<1x8x32xf32>
    %276 = vector.shape_cast %275 : vector<1x8x32xf32> to vector<8x32xf32>
    %277 = vector.shape_cast %270 : vector<8x32xf32> to vector<1x8x32xf32>
    tpu.vector_store %arg10[%274, %c0_147, %c0_148], %277 {strides = array<i32>} : memref<8x8x32xf32, #tpu.memory_space<vmem>>, vector<1x8x32xf32>,
    %c8_i32_149 = arith.constant 8 : i32
    %c1_i32_150 = arith.constant 1 : i32
    %c0_151 = arith.constant 0 : index
    %c0_152 = arith.constant 0 : index
    %278 = vector.load %arg14[%c0_151, %c0_152] : memref<8x32xf32, #tpu.memory_space<vmem>>, vector<8x32xf32>
    %c0_153 = arith.constant 0 : index
    %c0_154 = arith.constant 0 : index
    %c0_155 = arith.constant 0 : index
    %279 = vector.load %arg11[%c0_153, %c0_154, %c0_155] : memref<1x8x32xf32, #tpu.memory_space<vmem>>, vector<1x8x32xf32>
    %280 = vector.shape_cast %279 : vector<1x8x32xf32> to vector<8x32xf32>
    %281 = vector.shape_cast %278 : vector<8x32xf32> to vector<1x8x32xf32>
    tpu.vector_store %arg11[%c0_153, %c0_154, %c0_155], %281 {strides = array<i32>} : memref<1x8x32xf32, #tpu.memory_space<vmem>>, vector<1x8x32xf32>,
    %c0_156 = arith.constant 0 : index
    %c0_157 = arith.constant 0 : index
    %282 = vector.load %arg15[%c0_156, %c0_157] : memref<8x32xf32, #tpu.memory_space<vmem>>, vector<8x32xf32>
    %c0_158 = arith.constant 0 : index
    %c0_159 = arith.constant 0 : index
    %c0_160 = arith.constant 0 : index
    %283 = vector.load %arg12[%c0_158, %c0_159, %c0_160] : memref<1x8x32xf32, #tpu.memory_space<vmem>>, vector<1x8x32xf32>
    %284 = vector.shape_cast %283 : vector<1x8x32xf32> to vector<8x32xf32>
    %285 = vector.shape_cast %282 : vector<8x32xf32> to vector<1x8x32xf32>
    tpu.vector_store %arg12[%c0_158, %c0_159, %c0_160], %285 {strides = array<i32>} : memref<1x8x32xf32, #tpu.memory_space<vmem>>, vector<1x8x32xf32>,
    return
  }
  func.func @transform_0(%arg0: i32, %arg1: i32) -> (i32, i32, i32) {
    %c0_i32 = arith.constant 0 : i32
    %c0_i32_0 = arith.constant 0 : i32
    %c0_i32_1 = arith.constant 0 : i32
    return %c0_i32, %arg0, %c0_i32_0 : i32, i32, i32
  }
  func.func @transform_1(%arg0: i32, %arg1: i32) -> (i32, i32) {
    %c0_i32 = arith.constant 0 : i32
    %c0_i32_0 = arith.constant 0 : i32
    %c0_i32_1 = arith.constant 0 : i32
    return %c0_i32, %c0_i32_0 : i32, i32
  }
  func.func @transform_2(%arg0: i32, %arg1: i32) -> (i32, i32) {
    %c0_i32 = arith.constant 0 : i32
    %c0_i32_0 = arith.constant 0 : i32
    %c0_i32_1 = arith.constant 0 : i32
    return %c0_i32, %c0_i32_0 : i32, i32
  }
  func.func @transform_3(%arg0: i32, %arg1: i32) -> (i32, i32, i32) {
    %c1_i32 = arith.constant 1 : i32
    %0 = arith.subi %arg1, %c1_i32 : i32
    %c0_i32 = arith.constant 0 : i32
    %1 = arith.maxsi %0, %c0_i32 : i32
    %c0_i32_0 = arith.constant 0 : i32
    %c0_i32_1 = arith.constant 0 : i32
    %c0_i32_2 = arith.constant 0 : i32
    return %1, %c0_i32_0, %c0_i32_1 : i32, i32, i32
  }
  func.func @transform_4(%arg0: i32, %arg1: i32) -> (i32, i32, i32) {
    %c0_i32 = arith.constant 0 : i32
    %c0_i32_0 = arith.constant 0 : i32
    %c0_i32_1 = arith.constant 0 : i32
    return %arg1, %c0_i32, %c0_i32_0 : i32, i32, i32
  }
  func.func @transform_5(%arg0: i32, %arg1: i32) -> (i32, i32, i32) {
    %c1_i32 = arith.constant 1 : i32
    %0 = arith.subi %arg1, %c1_i32 : i32
    %c0_i32 = arith.constant 0 : i32
    %1 = arith.maxsi %0, %c0_i32 : i32
    %c0_i32_0 = arith.constant 0 : i32
    %c0_i32_1 = arith.constant 0 : i32
    %c0_i32_2 = arith.constant 0 : i32
    return %1, %c0_i32_0, %c0_i32_1 : i32, i32, i32
  }
  func.func @transform_6(%arg0: i32, %arg1: i32) -> (i32, i32, i32) {
    %c0_i32 = arith.constant 0 : i32
    %c0_i32_0 = arith.constant 0 : i32
    return %arg1, %arg0, %c0_i32 : i32, i32, i32
  }
  func.func @transform_7(%arg0: i32, %arg1: i32) -> (i32, i32, i32) {
    %c0_i32 = arith.constant 0 : i32
    %c0_i32_0 = arith.constant 0 : i32
    return %arg1, %arg0, %c0_i32 : i32, i32, i32
  }
  func.func @transform_8(%arg0: i32, %arg1: i32) -> (i32, i32, i32) {
    %c0_i32 = arith.constant 0 : i32
    %c0_i32_0 = arith.constant 0 : i32
    %c0_i32_1 = arith.constant 0 : i32
    return %c0_i32, %arg0, %c0_i32_0 : i32, i32, i32
  }
  func.func @transform_9(%arg0: i32, %arg1: i32) -> (i32, i32, i32) {
    %c0_i32 = arith.constant 0 : i32
    %c0_i32_0 = arith.constant 0 : i32
    return %arg1, %arg0, %c0_i32 : i32, i32, i32
  }
  func.func @transform_10(%arg0: i32, %arg1: i32) -> (i32, i32, i32) {
    %c0_i32 = arith.constant 0 : i32
    %c0_i32_0 = arith.constant 0 : i32
    return %arg1, %arg0, %c0_i32 : i32, i32, i32
  }
}

</mosaic_0001>

<bundles_post_ra>
// kernel: forward.3
= control target key start
LH: loop header
LB: loop body
LE: loop exit
PB: predicated region body
PF: predicated region fallthrough
CT: control target
= control target key end

     0   :  { %vm28_vm0 = vcmask 261120   ;;  %s220_s0 = inlined_call_operand.vmem [shape: f32[16,32], index: 0, kind: input, shape index: {}]   ;;  %s221_s1 = inlined_call_operand.vmem [shape: f32[32,128], index: 1, kind: input, shape index: {}]   ;;  %s222_s2 = inlined_call_operand.vmem [shape: f32[1,128], index: 2, kind: input, shape index: {}]   ;;  %s223_s3 = inlined_call_operand.hbm [shape: f32[16,128], index: 3, kind: output, shape index: {}]  }
   0x1   :  { %v20_v0 = vld [vmem:[%s221_s1 + $0x18] sm:$0xff]  ;;  %v19_v1 = vld [vmem:[%s221_s1 + $0x10] sm:$0xff]  ;;  %v15_v2 = vld [vmem:[%s220_s0] sm:$0xff] }
   0x2   :  { %137 = vmatprep.subr.mxu0 %v20_v0  ;;  %v18_v3 = vld [vmem:[%s221_s1 + $0x8] sm:$0xff]  ;;  %145 = vmatprep.mubr.msk.f32.mxu0 %vm28_vm0, %v15_v2 }
   0x3   :  { %138 = vmatpush3.msra.mxu0 %v20_v0 }
   0x4   :  { %8 = vsyncpa [#allocation3], 0  ;;  %139 = vmatprep.subr.mxu0 %v19_v1  ;;  %v17_v4 = vld [vmem:[%s221_s1] sm:$0xff]  ;;  %v16_v5 = vld [vmem:[%s220_s0 + $0x8] sm:$0xff]  ;;  %s173_s26 = smov [#allocation2]  }
   0x5   :  { %140 = vmatpush3.msra.mxu0 %v19_v1  ;;  %v128_v6 = vld [vmem:[%s222_s2] ss:$0 sm:$0xff]  ;;  %s117_s27 = sshll.u32 %s173_s26, 4  ;;  %s118_s27 = int_to_ptr.vmem [resolvable:$true] %s117_s27 }
   0x6   :  { %141 = vmatprep.subr.mxu0 %v18_v3  ;;  %s151_s1 = scalar_lea.vmem %s118_s27, 256  ;;  %p156_p1 = scmp.lt.s32.totalorder %s118_s27, %s118_s27 }
   0x7   :  { %142 = vmatpush3.msra.mxu0 %v18_v3  ;;  %p152_p0 = scmp.ne.s32.totalorder %s118_s27, %s151_s1  ;;  %p157_p2 = scmp.lt.s32.totalorder %s151_s1, %s151_s1 }
   0x8   :  { %143 = vmatprep.subr.mxu0 %v17_v4 }
   0x9   :  { %144 = vmatpush3.msra.mxu0 %v17_v4  ;;  %p158_p3 = por %p157_p2, %p156_p1 }
   0xa   :  { %146 = vmatmul.mubr.msk.f32.vlgmr.msra.gmra.mxu0 %vm28_vm0, %v16_v5 }
   0xb   :  { %p159_p4 = pnand %p158_p3, %p152_p0 }
  0xca   :  { %v147_v7 = vpop.f32.mrf.mxu0 }
  0xcb   :  { %v107_v8 = vadd.f32 %v147_v7, %v128_v6 }
  0xcc   :  { %v101_v9 = vpop.f32.mrf.mxu0 }
  0xcd   :  { %111 = vst [vmem:[#allocation2 + $0x8] sm:$0xff] %v107_v8  ;;  %v102_v10 = vadd.f32 %v128_v6, %v101_v9 }
  0xcf   :  { %110 = vst [vmem:[#allocation2] sm:$0xff] %v102_v10 }
  0xd0   :  { %162 = shalt.err (!%p159_p4)
}
  0xd1   :  { %s174_s0 = smov 128   ;;  %s175_s28 = smov 8  }
  0xd2   :  { %123 = dma.vmem_to_hbm [thread:$0]  %s118_s27, 256, %s223_s3, [#allocation3], %s174_s0, %s174_s0, %s175_s28  }
  0xd3   :  { %171 = dma.done.wait [#allocation3], 256  }
  0xd4   :  { %172 = vsyncadd [#allocation3], 4294967040 }
  0xd5   :  { %127 = vsyncpa [#allocation3], 1 }

// kernel: forward.2
= control target key start
LH: loop header
LB: loop body
LE: loop exit
PB: predicated region body
PF: predicated region fallthrough
CT: control target
= control target key end

     0   :  { %s2544_s13 = smov 0   ;;  %s2546_s14 = smov 0   ;;  %s2898_s0 = inlined_call_operand.vmem [shape: f32[8,8,16], index: 0, kind: input, shape index: {}]   ;;  %s2899_s1 = inlined_call_operand.vmem [shape: f32[16,128], index: 1, kind: input, shape index: {}]   ;;  %s2900_s2 = inlined_call_operand.vmem [shape: f32[1,128], index: 2, kind: input, shape index: {}]   ;;  %s2901_s3 = inlined_call_operand.vmem [shape: f32[1,32,128], index: 3, kind: input, shape index: {}]   ;;  %s2902_s4 = inlined_call_operand.vmem [shape: f32[2,32,128], index: 4, kind: input, shape index: {}]   ;;  %s2903_s5 = inlined_call_operand.vmem [shape: f32[1,1,128], index: 5, kind: input, shape index: {}]   ;;  %s2904_s6 = inlined_call_operand.vmem [shape: f32[2,8,32], index: 6, kind: input, shape index: {}]   ;;  %s2905_s7 = inlined_call_operand.vmem [shape: f32[2,8,32], index: 7, kind: input, shape index: {}]   ;;  %s2906_s8 = inlined_call_operand.vmem [shape: f32[8,8,32], index: 8, kind: output, shape index: {0}]   ;;  %s2907_s9 = inlined_call_operand.vmem [shape: f32[2,8,32], index: 9, kind: output, shape index: {1}]   ;;  %s2908_s10 = inlined_call_operand.vmem [shape: f32[2,8,32], index: 10, kind: output, shape index: {2}]  }
   0x1   :  { %s2548_s15 = smov 0  }
   0x2 LB: > { %s30_s16 = sadd.s32 1, %s2478_s14  ;;  %p2101_p0 = scmp.ge.s32.totalorder %s2482_s15, 1  ;;  %s2482_s15 = sphi %s2548_s15, %s21_s15   ;;  %s2478_s14 = sphi %s2546_s14, %s2910_s14   ;;  %s2474_s13 = sphi %s2544_s13, %s2909_s13  }
   0x3   : > { %p31_p1 = scmp.ge.s32.totalorder %s30_s16, 2  ;;  %p412_p2 = scmp.lt.s32.totalorder %s2482_s15, 3 }
   0x5   : > { %s2912_s16 = smov (%p31_p1, %s30_s16), 0  ;;  %p413_p3 = pnand %p2101_p0, %p412_p2 }
   0x6   : > { %p510_p4 = scmp.lt.s32.totalorder (!%p413_p3), %s2474_s13, 1  ;;  %p2122_p5 = scmp.ne.s32.totalorder (!%p413_p3), %s2474_s13, 0 }
   0x7   : > { %416 = sbr.rel (%p413_p3) target bundleno = 6035 (0x1793), region = 52 }
   0xc   : > { %s511_s17 = scalar_select %p510_p4, %s2474_s13, 1  ;;  %vm557_vm0 = vcmask 261120  }
   0xe   : > { %s2168_s18 = sshll.u32 %s511_s17, 5  ;;  %s2566_s19 = sshll.u32 %s511_s17, 3 }
   0xf   : > { %s2571_s22 = scalar_lea.vmem %s2902_s4, %s2168_s18  ;;  %s530_s25 = scalar_lea.vmem %s2904_s6, %s2566_s19 }
  0x10   : > { %s548_s28 = scalar_lea.vmem %s2907_s9, %s2566_s19  ;;  %s555_s11 = scalar_lea.vmem %s2908_s10, %s2566_s19  ;;  %v556_v0 = vld [vmem:[%s530_s25] sm:$0xff] }
  0x11   : > { %558 = vst.msk [vmem:[#allocation3] sm:$0xff] %vm557_vm0, %v556_v0  ;;  %s537_s18 = scalar_lea.vmem %s2905_s7, %s2566_s19  ;;  %564 = sbr.rel (%p2122_p5) target bundleno = 230 (0xe6), region = 56 }
  0x12   : > { %v559_v1 = vld [vmem:[%s537_s18] sm:$0xff] }
  0x13   : > { %560 = vst.msk [vmem:[#allocation4] sm:$0xff] %vm557_vm0, %v559_v1 }
  0x16   : > { %v576_v2 = vld [vmem:[%s2899_s1 + $0x8] sm:$0xff]  ;;  %v575_v3 = vld [vmem:[%s2899_s1] sm:$0xff]  ;;  %vm584_vm1 = vcmask 130048   ;;  %v569_v8 = vld [vmem:[%s2898_s0 + $0x10] sm:$0xff] }
  0x17   : > { %2231 = vmatprep.subr.mxu0 %v576_v2  ;;  %2355 = vmatprep.subr.mxu1 %v576_v2  ;;  %v567_v4 = vld [vmem:[%s2898_s0] sm:$0xff]  ;;  %v568_v6 = vld [vmem:[%s2898_s0 + $0x8] sm:$0xff]  ;;  %v573_v9 = vld [vmem:[%s2898_s0 + $0x30] sm:$0xff] }
  0x18   : > { %2232 = vmatpush3.msra.mxu0 %v576_v2  ;;  %2357 = vmatpush3.msra.mxu1 %v576_v2  ;;  %v571_v5 = vld [vmem:[%s2898_s0 + $0x20] sm:$0xff]  ;;  %v572_v7 = vld [vmem:[%s2898_s0 + $0x28] sm:$0xff]  ;;  %v570_v10 = vld [vmem:[%s2898_s0 + $0x18] sm:$0xff] }
  0x19   : > { %2233 = vmatprep.subr.mxu0 %v575_v3  ;;  %2356 = vmatprep.subr.mxu1 %v575_v3  ;;  %v574_v11 = vld [vmem:[%s2898_s0 + $0x38] sm:$0xff]  ;;  %v2123_v12 = vld [vmem:[%s2900_s2] ss:$0 sm:$0xff] }
  0x1a   : > { %2234 = vmatpush3.msra.mxu0 %v575_v3  ;;  %2358 = vmatpush3.msra.mxu1 %v575_v3 }
  0x1b   : > { %2235 = vmatprep.mubr.msk.f32.mxu0 %vm584_vm1, %v567_v4  ;;  %2241 = vmatprep.mubr.msk.f32.mxu1 %vm584_vm1, %v571_v5 }
  0x1c   : > { %2236 = vmatmul.mubr.msk.f32.vlgmr.msra.gmra.mxu0 %vm584_vm1, %v568_v6  ;;  %2242 = vmatmul.mubr.msk.f32.vlgmr.msra.gmra.mxu1 %vm584_vm1, %v572_v7 }
  0x1d   : > { %2238 = vmatprep.mubr.msk.f32.mxu0 %vm584_vm1, %v569_v8  ;;  %2244 = vmatprep.mubr.msk.f32.mxu1 %vm584_vm1, %v573_v9 }
  0x20   : > { %2239 = vmatmul.mubr.msk.f32.gmra.mxu0 %vm584_vm1, %v570_v10  ;;  %2245 = vmatmul.mubr.msk.f32.gmra.mxu1 %vm584_vm1, %v574_v11 }
  0xdc   : > { %v2237_v13 = vpop.f32.mrf.mxu0  ;;  %v2243_v14 = vpop.f32.mrf.mxu1 }
  0xdd   : > { %v681_v15 = vadd.f32 %v2237_v13, %v2123_v12  ;;  %v701_v16 = vadd.f32 %v2243_v14, %v2123_v12 }
  0xde   : > { %v675_v17 = vpop.f32.mrf.mxu0  ;;  %v695_v18 = vpop.f32.mrf.mxu1 }
  0xdf   : > { %715 = vst [vmem:[#allocation2] sm:$0xff] %v681_v15  ;;  %719 = vst [vmem:[#allocation2 + $0x20] sm:$0xff] %v701_v16  ;;  %v676_v19 = vadd.f32 %v2123_v12, %v675_v17  ;;  %v696_v20 = vadd.f32 %v2123_v12, %v695_v18 }
  0xe0   : > { %v2240_v21 = vpop.f32.mrf.mxu0  ;;  %v2246_v22 = vpop.f32.mrf.mxu1 }
  0xe1   : > { %714 = vst [vmem:[#allocation2 + $0x30] sm:$0xff] %v676_v19  ;;  %718 = vst [vmem:[#allocation2 + $0x8] sm:$0xff] %v696_v20  ;;  %v691_v23 = vadd.f32 %v2240_v21, %v2123_v12  ;;  %v711_v24 = vadd.f32 %v2246_v22, %v2123_v12 }
  0xe2   : > { %v685_v25 = vpop.f32.mrf.mxu0  ;;  %v705_v26 = vpop.f32.mrf.mxu1 }
  0xe3   : > { %717 = vst [vmem:[#allocation2 + $0x10] sm:$0xff] %v691_v23  ;;  %721 = vst [vmem:[#allocation2 + $0x38] sm:$0xff] %v711_v24  ;;  %v686_v27 = vadd.f32 %v2123_v12, %v685_v25  ;;  %v706_v28 = vadd.f32 %v2123_v12, %v705_v26 }
  0xe5   : > { %716 = vst [vmem:[#allocation2 + $0x18] sm:$0xff] %v686_v27  ;;  %720 = vst [vmem:[#allocation2 + $0x28] sm:$0xff] %v706_v28 }
  0xe6 PF: > { %p2132_p6 = scmp.le.s32.totalorder %s2474_s13, 0 }
  0xe8   : > { %725 = sbr.rel (%p2132_p6) target bundleno = 449 (0x1c1), region = 60 }
  0xed   : > { %v739_v29 = vld [vmem:[%s2901_s3 + $0x18] sm:$0xff]  ;;  %v738_v30 = vld [vmem:[%s2901_s3 + $0x10] sm:$0xff]  ;;  %v737_v31 = vld [vmem:[%s2901_s3 + $0x8] sm:$0xff] }
  0xee   : > { %2247 = vmatprep.subr.mxu0 %v739_v29  ;;  %2359 = vmatprep.subr.mxu1 %v739_v29  ;;  %v736_v32 = vld [vmem:[%s2901_s3] sm:$0xff]  ;;  %v729_v35 = vld [vmem:[%s2906_s8 + $0x8] sm:$0xff]  ;;  %v730_v37 = vld [vmem:[%s2906_s8 + $0x10] sm:$0xff] }
  0xef   : > { %2248 = vmatpush3.msra.mxu0 %v739_v29  ;;  %2363 = vmatpush3.msra.mxu1 %v739_v29  ;;  %v728_v33 = vld [vmem:[%s2906_s8] sm:$0xff]  ;;  %v733_v36 = vld [vmem:[%s2906_s8 + $0x28] sm:$0xff]  ;;  %v734_v38 = vld [vmem:[%s2906_s8 + $0x30] sm:$0xff] }
  0xf0   : > { %2249 = vmatprep.subr.mxu0 %v738_v30  ;;  %2360 = vmatprep.subr.mxu1 %v738_v30  ;;  %v732_v34 = vld [vmem:[%s2906_s8 + $0x20] sm:$0xff]  ;;  %v731_v39 = vld [vmem:[%s2906_s8 + $0x18] sm:$0xff] }
  0xf1   : > { %2250 = vmatpush3.msra.mxu0 %v738_v30  ;;  %2364 = vmatpush3.msra.mxu1 %v738_v30  ;;  %v735_v40 = vld [vmem:[%s2906_s8 + $0x38] sm:$0xff]  ;;  %v2133_v41 = vld [vmem:[%s2903_s5] ss:$0 sm:$0xff] }
  0xf2   : > { %2251 = vmatprep.subr.mxu0 %v737_v31  ;;  %2361 = vmatprep.subr.mxu1 %v737_v31 }
  0xf3   : > { %2252 = vmatpush3.msra.mxu0 %v737_v31  ;;  %2365 = vmatpush3.msra.mxu1 %v737_v31 }
  0xf4   : > { %2253 = vmatprep.subr.mxu0 %v736_v32  ;;  %2362 = vmatprep.subr.mxu1 %v736_v32 }
  0xf5   : > { %2254 = vmatpush3.msra.mxu0 %v736_v32  ;;  %2366 = vmatpush3.msra.mxu1 %v736_v32 }
  0xf6   : > { %2255 = vmatprep.mubr.msk.f32.mxu0 %vm557_vm0, %v728_v33  ;;  %2261 = vmatprep.mubr.msk.f32.mxu1 %vm557_vm0, %v732_v34 }
  0xf7   : > { %2256 = vmatmul.mubr.msk.f32.vlgmr.msra.gmra.mxu0 %vm557_vm0, %v729_v35  ;;  %2262 = vmatmul.mubr.msk.f32.vlgmr.msra.gmra.mxu1 %vm557_vm0, %v733_v36 }
  0xf8   : > { %2258 = vmatprep.mubr.msk.f32.mxu0 %vm557_vm0, %v730_v37  ;;  %2264 = vmatprep.mubr.msk.f32.mxu1 %vm557_vm0, %v734_v38 }
  0xfb   : > { %2259 = vmatmul.mubr.msk.f32.gmra.mxu0 %vm557_vm0, %v731_v39  ;;  %2265 = vmatmul.mubr.msk.f32.gmra.mxu1 %vm557_vm0, %v735_v40 }
 0x1b7   : > { %v2257_v42 = vpop.f32.mrf.mxu0  ;;  %v2263_v43 = vpop.f32.mrf.mxu1 }
 0x1b8   : > { %v843_v44 = vadd.f32 %v2257_v42, %v2133_v41  ;;  %v863_v45 = vadd.f32 %v2263_v43, %v2133_v41 }
 0x1b9   : > { %v837_v46 = vpop.f32.mrf.mxu0  ;;  %v857_v47 = vpop.f32.mrf.mxu1 }
 0x1ba   : > { %877 = vst [vmem:[#allocation2] sm:$0xff] %v843_v44  ;;  %881 = vst [vmem:[#allocation2 + $0x20] sm:$0xff] %v863_v45  ;;  %v838_v48 = vadd.f32 %v2133_v41, %v837_v46  ;;  %v858_v49 = vadd.f32 %v2133_v41, %v857_v47 }
 0x1bb   : > { %v2260_v50 = vpop.f32.mrf.mxu0  ;;  %v2266_v51 = vpop.f32.mrf.mxu1 }
 0x1bc   : > { %876 = vst [vmem:[#allocation2 + $0x30] sm:$0xff] %v838_v48  ;;  %880 = vst [vmem:[#allocation2 + $0x8] sm:$0xff] %v858_v49  ;;  %v853_v52 = vadd.f32 %v2260_v50, %v2133_v41  ;;  %v873_v53 = vadd.f32 %v2266_v51, %v2133_v41 }
 0x1bd   : > { %v847_v54 = vpop.f32.mrf.mxu0  ;;  %v867_v55 = vpop.f32.mrf.mxu1 }
 0x1be   : > { %879 = vst [vmem:[#allocation2 + $0x10] sm:$0xff] %v853_v52  ;;  %883 = vst [vmem:[#allocation2 + $0x38] sm:$0xff] %v873_v53  ;;  %v848_v56 = vadd.f32 %v2133_v41, %v847_v54  ;;  %v868_v57 = vadd.f32 %v2133_v41, %v867_v55 }
 0x1c0   : > { %878 = vst [vmem:[#allocation2 + $0x18] sm:$0xff] %v848_v56  ;;  %882 = vst [vmem:[#allocation2 + $0x28] sm:$0xff] %v868_v57 }
 0x1c1 PF: > { %v2682_v58 = vld [vmem:[%s2571_s22 + $0x18] sm:$0xff]  ;;  %v2484_v59 = vmov 0.0   ;;  %v2686_v60 = vld [vmem:[%s2571_s22 + $0x10] sm:$0xff]  ;;  %vm2485_vm2 = vmmov 0   ;;  %v2694_v61 = vld [vmem:[%s2571_s22 + $0x8] sm:$0xff]  ;;  %s2487_s17 = smov 96  }
 0x1c2   : > { %2267 = vmatprep.subr.mxu0 %v2484_v59  ;;  %2275 = vmatprep.mubr.msk.f32.mxu0 %vm2485_vm2, %v2484_v59  ;;  %v2701_v62 = vld [vmem:[%s2571_s22] sm:$0xff]  ;;  %s2486_s22 = smov 32   ;;  %v971_v5 = vld [vmem:[#allocation4] sm:$0xff]  ;;  %s2488_s18 = smov 64  }
 0x1c3   : > { %2268 = vmatpush3.msra.mxu0 %v2682_v58  ;;  %2278 = vmatprep.subr.mxu1 %v2484_v59  ;;  %v885_v63 = vld [vmem:[#allocation3] sm:$0xff]  ;;  %v884_v0 = vld [vmem:[#allocation2 + $0x30] sm:$0xff] }
 0x1c4   : > { %2269 = vmatprep.subr.mxu0 %v2484_v59  ;;  %2279 = vmatpush3.msra.mxu1 %v2682_v58  ;;  %v1007_v23 = vld [vmem:[#allocation2] sm:$0xff] }
 0x1c5   : > { %2270 = vmatpush3.msra.mxu0 %v2686_v60  ;;  %2280 = vmatprep.subr.mxu1 %v2484_v59 }
 0x1c6   : > { %2271 = vmatprep.subr.mxu0 %v2484_v59  ;;  %2281 = vmatpush3.msra.mxu1 %v2686_v60 }
 0x1c7   : > { %2272 = vmatpush3.msra.mxu0 %v2694_v61  ;;  %2282 = vmatprep.subr.mxu1 %v2484_v59  ;;  %v1131_v45 = vld [vmem:[#allocation2 + $0x18] sm:$0xff] }
 0x1c8   : > { %2273 = vmatprep.subr.mxu0 %v2484_v59  ;;  %2283 = vmatpush3.msra.mxu1 %v2694_v61 }
 0x1c9   : > { %2274 = vmatpush3.msra.mxu0 %v2701_v62  ;;  %2284 = vmatprep.subr.mxu1 %v2484_v59 }
 0x1ca   : > { %2276 = vmatmul.mubr.msk.f32.vlgmr.msra.gmra.mxu0 %vm557_vm0, %v885_v63  ;;  %2285 = vmatpush3.msra.mxu1 %v2701_v62 }
 0x1cb   : > { %2286 = vmatprep.mubr.msk.f32.mxu1 %vm2485_vm2, %v2484_v59  ;;  %2289 = vmatprep.subr.mxu0 %v2484_v59 }
 0x1cc   : > { %2290 = vmatpush3.msra.mxu0 %v2682_v58  ;;  %2297 = vmatprep.mubr.msk.f32.mxu0 %vm2485_vm2, %v2484_v59 }
 0x1cd   : > { %2291 = vmatprep.subr.mxu0 %v2484_v59  ;;  %2300 = vmatprep.subr.mxu1 %v2484_v59 }
 0x1ce   : > { %2292 = vmatpush3.msra.mxu0 %v2686_v60 }
 0x1cf   : > { %2293 = vmatprep.subr.mxu0 %v2484_v59 }
 0x1d0   : > { %2294 = vmatpush3.msra.mxu0 %v2694_v61 }
 0x1d1   : > { %2295 = vmatprep.subr.mxu0 %v2484_v59 }
 0x1d2   : > { %2296 = vmatpush3.msra.mxu0 %v2701_v62 }
 0x1d3   : > { %2311 = vmatprep.subr.mxu0 %v2484_v59 }
 0x28a   : > { %v959_v1 = vpop.f32.mrf.mxu0 }
 0x28b   : > { %v963_v2 = vadd.f32 %v959_v1, %v884_v0 }
 0x28c   : > { %v2277_v3 = vpop.f32.mrf.mxu0 }
 0x28d   : > { %2396 = vtanh.f32 %v963_v2  ;;  %v2143_v6 = vmul.f32 -1.442695, %v963_v2 }
 0x28f   : > { %2398 = vpow2.f32 %v2143_v6 }
 0x29a   : > { %v2397_v4 = vpop.eup %2396 }
 0x29b   : > { %978 = vrot.lane.b32.xlu0 %v2397_v4, %s2486_s22 }
 0x29c   : > { %v2399_v7 = vpop.eup %2398 }
 0x29d   : > { %v967_v8 = vadd.f32 1.0, %v2399_v7 }
 0x29f   : > { %973 = vrot.lane.b32.xlu0 %v971_v5, %s2486_s22  ;;  %2400 = vrcp.f32 %v967_v8  ;;  %v1255_v8 = vld [vmem:[#allocation2 + $0x10] sm:$0xff] }
 0x2ac   : > { %v2401_v9 = vpop.eup %2400 }
 0x30d   : > { %v979_v10 = vpop.permute.xlu0 %978 }
 0x30e   : > { %v981_v11 = vmul.f32 %v2401_v9, %v979_v10 }
 0x310   : > { %983 = vrot.lane.b32.xlu1 %v981_v11, %s2486_s22 }
 0x311   : > { %v974_v12 = vpop.permute.xlu0 %973 }
 0x312   : > { %v976_v13 = vmul.f32 %v2401_v9, %v974_v12 }
 0x382   : > { %v984_v14 = vpop.permute.xlu1 %983 }
 0x383   : > { %v986_v15 = vadd.f32 %v984_v14, %v976_v13 }
 0x385   : > { %2402 = vtanh.f32 %v986_v15 }
 0x392   : > { %v2403_v16 = vpop.eup %2402 }
 0x393   : > { %989 = vrot.lane.b32.xlu1 %v2403_v16, %s2486_s22 }
 0x397   : > { %994 = vrot.lane.b32.xlu1 %v986_v15, %s2487_s17 }
 0x405   : > { %v990_v17 = vpop.permute.xlu1 %989 }
 0x406   : > { %v992_v18 = vmul.f32 %v2401_v9, %v990_v17 }
 0x408   : > { %999 = vrot.lane.b32.xlu0 %v992_v18, %s2488_s18 }
 0x409   : > { %v995_v19 = vpop.permute.xlu1 %994 }
 0x40a   : > { %997 = vst.msk [vmem:[#allocation4] sm:$0xff] %vm557_vm0, %v995_v19 }
 0x411   : > { %v1094_v20 = vld [vmem:[#allocation4] sm:$0xff] }
 0x412   : > { %1096 = vrot.lane.b32.xlu1 %v1094_v20, %s2486_s22 }
 0x47a   : > { %v1000_v21 = vpop.permute.xlu0 %999 }
 0x47b   : > { %1002 = vst.msk [vmem:[#allocation3] sm:$0xff] %vm557_vm0, %v1000_v21  ;;  %1005 = vst.msk [vmem:[%s2906_s8] sm:$0xff] %vm557_vm0, %v1000_v21 }
 0x482   : > { %v1008_v22 = vld [vmem:[#allocation3] sm:$0xff] }
 0x483   : > { %2287 = vmatmul.mubr.msk.f32.vlgmr.msra.gmra.mxu1 %vm557_vm0, %v1008_v22 }
 0x484   : > { %2301 = vmatpush3.msra.mxu1 %v2682_v58  ;;  %2308 = vmatprep.mubr.msk.f32.mxu1 %vm2485_vm2, %v2484_v59  ;;  %v1097_v34 = vpop.permute.xlu1 %1096 }
 0x485   : > { %2302 = vmatprep.subr.mxu1 %v2484_v59 }
 0x486   : > { %2303 = vmatpush3.msra.mxu1 %v2686_v60 }
 0x487   : > { %2304 = vmatprep.subr.mxu1 %v2484_v59 }
 0x488   : > { %2305 = vmatpush3.msra.mxu1 %v2694_v61 }
 0x489   : > { %2306 = vmatprep.subr.mxu1 %v2484_v59 }
 0x48a   : > { %2307 = vmatpush3.msra.mxu1 %v2701_v62 }
 0x48b   : > { %2322 = vmatprep.subr.mxu1 %v2484_v59 }
 0x543   : > { %v1082_v24 = vpop.f32.mrf.mxu1 }
 0x544   : > { %v1086_v25 = vadd.f32 %v1082_v24, %v1007_v23 }
 0x545   : > { %v2288_v26 = vpop.f32.mrf.mxu1 }
 0x546   : > { %2404 = vtanh.f32 %v1086_v25  ;;  %v2145_v28 = vmul.f32 -1.442695, %v1086_v25 }
 0x548   : > { %2406 = vpow2.f32 %v2145_v28 }
 0x553   : > { %v2405_v27 = vpop.eup %2404 }
 0x554   : > { %1101 = vrot.lane.b32.xlu0 %v2405_v27, %s2486_s22 }
 0x555   : > { %v2407_v29 = vpop.eup %2406 }
 0x556   : > { %v1090_v30 = vadd.f32 1.0, %v2407_v29 }
 0x558   : > { %2408 = vrcp.f32 %v1090_v30  ;;  %v1379_v30 = vld [vmem:[#allocation2 + $0x8] sm:$0xff] }
 0x565   : > { %v2409_v31 = vpop.eup %2408 }
 0x566   : > { %v1099_v35 = vmul.f32 %v2409_v31, %v1097_v34 }
 0x5c6   : > { %v1102_v32 = vpop.permute.xlu0 %1101 }
 0x5c7   : > { %v1104_v33 = vmul.f32 %v2409_v31, %v1102_v32 }
 0x5c9   : > { %1106 = vrot.lane.b32.xlu0 %v1104_v33, %s2486_s22 }
 0x63b   : > { %v1107_v36 = vpop.permute.xlu0 %1106 }
 0x63c   : > { %v1109_v37 = vadd.f32 %v1107_v36, %v1099_v35 }
 0x63e   : > { %2410 = vtanh.f32 %v1109_v37 }
 0x64b   : > { %v2411_v38 = vpop.eup %2410 }
 0x64c   : > { %1112 = vrot.lane.b32.xlu1 %v2411_v38, %s2486_s22 }
 0x650   : > { %1117 = vrot.lane.b32.xlu1 %v1109_v37, %s2487_s17 }
 0x6be   : > { %v1113_v39 = vpop.permute.xlu1 %1112 }
 0x6bf   : > { %v1115_v40 = vmul.f32 %v2409_v31, %v1113_v39 }
 0x6c1   : > { %1122 = vrot.lane.b32.xlu0 %v1115_v40, %s2488_s18 }
 0x6c2   : > { %v1118_v41 = vpop.permute.xlu1 %1117 }
 0x6c3   : > { %1120 = vst.msk [vmem:[#allocation4] sm:$0xff] %vm557_vm0, %v1118_v41 }
 0x6ca   : > { %v1218_v42 = vld [vmem:[#allocation4] sm:$0xff] }
 0x6cb   : > { %1220 = vrot.lane.b32.xlu1 %v1218_v42, %s2486_s22 }
 0x733   : > { %v1123_v43 = vpop.permute.xlu0 %1122 }
 0x734   : > { %1125 = vst.msk [vmem:[#allocation3] sm:$0xff] %vm557_vm0, %v1123_v43  ;;  %2146 = vst.msk [vmem:[%s2906_s8 + $0x8] sm:$0xff] %vm557_vm0, %v1123_v43 }
 0x73b   : > { %v1132_v44 = vld [vmem:[#allocation3] sm:$0xff] }
 0x73c   : > { %2298 = vmatmul.mubr.msk.f32.vlgmr.msra.gmra.mxu0 %vm557_vm0, %v1132_v44 }
 0x73d   : > { %2312 = vmatpush3.msra.mxu0 %v2682_v58  ;;  %2319 = vmatprep.mubr.msk.f32.mxu0 %vm2485_vm2, %v2484_v59  ;;  %v1221_v56 = vpop.permute.xlu1 %1220 }
 0x73e   : > { %2313 = vmatprep.subr.mxu0 %v2484_v59 }
 0x73f   : > { %2314 = vmatpush3.msra.mxu0 %v2686_v60 }
 0x740   : > { %2315 = vmatprep.subr.mxu0 %v2484_v59 }
 0x741   : > { %2316 = vmatpush3.msra.mxu0 %v2694_v61 }
 0x742   : > { %2317 = vmatprep.subr.mxu0 %v2484_v59 }
 0x743   : > { %2318 = vmatpush3.msra.mxu0 %v2701_v62 }
 0x744   : > { %2333 = vmatprep.subr.mxu0 %v2484_v59 }
 0x7fc   : > { %v1206_v46 = vpop.f32.mrf.mxu0 }
 0x7fd   : > { %v1210_v47 = vadd.f32 %v1206_v46, %v1131_v45 }
 0x7fe   : > { %v2299_v48 = vpop.f32.mrf.mxu0 }
 0x7ff   : > { %2412 = vtanh.f32 %v1210_v47  ;;  %v2148_v50 = vmul.f32 -1.442695, %v1210_v47 }
 0x801   : > { %2414 = vpow2.f32 %v2148_v50 }
 0x80c   : > { %v2413_v49 = vpop.eup %2412 }
 0x80d   : > { %1225 = vrot.lane.b32.xlu0 %v2413_v49, %s2486_s22 }
 0x80e   : > { %v2415_v51 = vpop.eup %2414 }
 0x80f   : > { %v1214_v52 = vadd.f32 1.0, %v2415_v51 }
 0x811   : > { %2416 = vrcp.f32 %v1214_v52  ;;  %v1503_v52 = vld [vmem:[#allocation2 + $0x20] sm:$0xff] }
 0x81e   : > { %v2417_v53 = vpop.eup %2416 }
 0x81f   : > { %v1223_v57 = vmul.f32 %v2417_v53, %v1221_v56 }
 0x87f   : > { %v1226_v54 = vpop.permute.xlu0 %1225 }
 0x880   : > { %v1228_v55 = vmul.f32 %v2417_v53, %v1226_v54 }
 0x882   : > { %1230 = vrot.lane.b32.xlu0 %v1228_v55, %s2486_s22 }
 0x8f4   : > { %v1231_v63 = vpop.permute.xlu0 %1230 }
 0x8f5   : > { %v1233_v0 = vadd.f32 %v1231_v63, %v1223_v57 }
 0x8f7   : > { %2418 = vtanh.f32 %v1233_v0 }
 0x904   : > { %v2419_v1 = vpop.eup %2418 }
 0x905   : > { %1236 = vrot.lane.b32.xlu1 %v2419_v1, %s2486_s22 }
 0x909   : > { %1241 = vrot.lane.b32.xlu1 %v1233_v0, %s2487_s17 }
 0x977   : > { %v1237_v2 = vpop.permute.xlu1 %1236 }
 0x978   : > { %v1239_v3 = vmul.f32 %v2417_v53, %v1237_v2 }
 0x97a   : > { %1246 = vrot.lane.b32.xlu0 %v1239_v3, %s2488_s18 }
 0x97b   : > { %v1242_v4 = vpop.permute.xlu1 %1241 }
 0x97c   : > { %1244 = vst.msk [vmem:[#allocation4] sm:$0xff] %vm557_vm0, %v1242_v4 }
 0x983   : > { %v1342_v5 = vld [vmem:[#allocation4] sm:$0xff] }
 0x984   : > { %1344 = vrot.lane.b32.xlu1 %v1342_v5, %s2486_s22 }
 0x9ec   : > { %v1247_v6 = vpop.permute.xlu0 %1246 }
 0x9ed   : > { %1249 = vst.msk [vmem:[#allocation3] sm:$0xff] %vm557_vm0, %v1247_v6  ;;  %2149 = vst.msk [vmem:[%s2906_s8 + $0x10] sm:$0xff] %vm557_vm0, %v1247_v6 }
 0x9f4   : > { %v1256_v7 = vld [vmem:[#allocation3] sm:$0xff] }
 0x9f5   : > { %2309 = vmatmul.mubr.msk.f32.vlgmr.msra.gmra.mxu1 %vm557_vm0, %v1256_v7 }
 0x9f6   : > { %2323 = vmatpush3.msra.mxu1 %v2682_v58  ;;  %2330 = vmatprep.mubr.msk.f32.mxu1 %vm2485_vm2, %v2484_v59  ;;  %v1345_v19 = vpop.permute.xlu1 %1344 }
 0x9f7   : > { %2324 = vmatprep.subr.mxu1 %v2484_v59 }
 0x9f8   : > { %2325 = vmatpush3.msra.mxu1 %v2686_v60 }
 0x9f9   : > { %2326 = vmatprep.subr.mxu1 %v2484_v59 }
 0x9fa   : > { %2327 = vmatpush3.msra.mxu1 %v2694_v61 }
 0x9fb   : > { %2328 = vmatprep.subr.mxu1 %v2484_v59 }
 0x9fc   : > { %2329 = vmatpush3.msra.mxu1 %v2701_v62 }
 0x9fd   : > { %2344 = vmatprep.subr.mxu1 %v2484_v59 }
 0xab5   : > { %v1330_v9 = vpop.f32.mrf.mxu1 }
 0xab6   : > { %v1334_v10 = vadd.f32 %v1330_v9, %v1255_v8 }
 0xab7   : > { %v2310_v11 = vpop.f32.mrf.mxu1 }
 0xab8   : > { %2420 = vtanh.f32 %v1334_v10  ;;  %v2151_v13 = vmul.f32 -1.442695, %v1334_v10  ;;  %v1627_v10 = vld [vmem:[#allocation2 + $0x28] sm:$0xff] }
 0xaba   : > { %2422 = vpow2.f32 %v2151_v13 }
 0xac5   : > { %v2421_v12 = vpop.eup %2420 }
 0xac6   : > { %1349 = vrot.lane.b32.xlu0 %v2421_v12, %s2486_s22 }
 0xac7   : > { %v2423_v14 = vpop.eup %2422 }
 0xac8   : > { %v1338_v15 = vadd.f32 1.0, %v2423_v14 }
 0xaca   : > { %2424 = vrcp.f32 %v1338_v15 }
 0xad7   : > { %v2425_v16 = vpop.eup %2424 }
 0xad8   : > { %v1347_v20 = vmul.f32 %v2425_v16, %v1345_v19 }
 0xb38   : > { %v1350_v17 = vpop.permute.xlu0 %1349 }
 0xb39   : > { %v1352_v18 = vmul.f32 %v2425_v16, %v1350_v17 }
 0xb3b   : > { %1354 = vrot.lane.b32.xlu0 %v1352_v18, %s2486_s22 }
 0xbad   : > { %v1355_v21 = vpop.permute.xlu0 %1354 }
 0xbae   : > { %v1357_v22 = vadd.f32 %v1355_v21, %v1347_v20 }
 0xbb0   : > { %2426 = vtanh.f32 %v1357_v22 }
 0xbbd   : > { %v2427_v23 = vpop.eup %2426 }
 0xbbe   : > { %1360 = vrot.lane.b32.xlu1 %v2427_v23, %s2486_s22 }
 0xbc2   : > { %1365 = vrot.lane.b32.xlu1 %v1357_v22, %s2487_s17 }
 0xc30   : > { %v1361_v24 = vpop.permute.xlu1 %1360 }
 0xc31   : > { %v1363_v25 = vmul.f32 %v2425_v16, %v1361_v24 }
 0xc33   : > { %1370 = vrot.lane.b32.xlu0 %v1363_v25, %s2488_s18 }
 0xc34   : > { %v1366_v26 = vpop.permute.xlu1 %1365 }
 0xc35   : > { %1368 = vst.msk [vmem:[#allocation4] sm:$0xff] %vm557_vm0, %v1366_v26 }
 0xc3c   : > { %v1466_v27 = vld [vmem:[#allocation4] sm:$0xff] }
 0xc3d   : > { %1468 = vrot.lane.b32.xlu1 %v1466_v27, %s2486_s22 }
 0xca5   : > { %v1371_v28 = vpop.permute.xlu0 %1370 }
 0xca6   : > { %1373 = vst.msk [vmem:[#allocation3] sm:$0xff] %vm557_vm0, %v1371_v28  ;;  %2152 = vst.msk [vmem:[%s2906_s8 + $0x18] sm:$0xff] %vm557_vm0, %v1371_v28 }
 0xcad   : > { %v1380_v29 = vld [vmem:[#allocation3] sm:$0xff] }
 0xcae   : > { %2320 = vmatmul.mubr.msk.f32.vlgmr.msra.gmra.mxu0 %vm557_vm0, %v1380_v29 }
 0xcaf   : > { %2334 = vmatpush3.msra.mxu0 %v2682_v58  ;;  %2341 = vmatprep.mubr.msk.f32.mxu0 %vm2485_vm2, %v2484_v59  ;;  %v1469_v41 = vpop.permute.xlu1 %1468 }
 0xcb0   : > { %2335 = vmatprep.subr.mxu0 %v2484_v59 }
 0xcb1   : > { %2336 = vmatpush3.msra.mxu0 %v2686_v60 }
 0xcb2   : > { %2337 = vmatprep.subr.mxu0 %v2484_v59 }
 0xcb3   : > { %2338 = vmatpush3.msra.mxu0 %v2694_v61 }
 0xcb4   : > { %2339 = vmatprep.subr.mxu0 %v2484_v59 }
 0xcb5   : > { %2340 = vmatpush3.msra.mxu0 %v2701_v62 }
 0xd6e   : > { %v1454_v31 = vpop.f32.mrf.mxu0 }
 0xd6f   : > { %v1458_v32 = vadd.f32 %v1454_v31, %v1379_v30 }
 0xd70   : > { %v2321_v33 = vpop.f32.mrf.mxu0 }
 0xd71   : > { %2428 = vtanh.f32 %v1458_v32  ;;  %v2154_v35 = vmul.f32 -1.442695, %v1458_v32  ;;  %v1751_v32 = vld [vmem:[#allocation2 + $0x38] sm:$0xff] }
 0xd73   : > { %2430 = vpow2.f32 %v2154_v35 }
 0xd7e   : > { %v2429_v34 = vpop.eup %2428 }
 0xd7f   : > { %1473 = vrot.lane.b32.xlu0 %v2429_v34, %s2486_s22 }
 0xd80   : > { %v2431_v36 = vpop.eup %2430 }
 0xd81   : > { %v1462_v37 = vadd.f32 1.0, %v2431_v36 }
 0xd83   : > { %2432 = vrcp.f32 %v1462_v37 }
 0xd90   : > { %v2433_v38 = vpop.eup %2432 }
 0xd91   : > { %v1471_v42 = vmul.f32 %v2433_v38, %v1469_v41 }
 0xdf1   : > { %v1474_v39 = vpop.permute.xlu0 %1473 }
 0xdf2   : > { %v1476_v40 = vmul.f32 %v2433_v38, %v1474_v39 }
 0xdf4   : > { %1478 = vrot.lane.b32.xlu0 %v1476_v40, %s2486_s22 }
 0xe66   : > { %v1479_v43 = vpop.permute.xlu0 %1478 }
 0xe67   : > { %v1481_v44 = vadd.f32 %v1479_v43, %v1471_v42 }
 0xe69   : > { %2434 = vtanh.f32 %v1481_v44 }
 0xe76   : > { %v2435_v45 = vpop.eup %2434 }
 0xe77   : > { %1484 = vrot.lane.b32.xlu1 %v2435_v45, %s2486_s22 }
 0xe7b   : > { %1489 = vrot.lane.b32.xlu1 %v1481_v44, %s2487_s17 }
 0xee9   : > { %v1485_v46 = vpop.permute.xlu1 %1484 }
 0xeea   : > { %v1487_v47 = vmul.f32 %v2433_v38, %v1485_v46 }
 0xeec   : > { %1494 = vrot.lane.b32.xlu0 %v1487_v47, %s2488_s18 }
 0xeed   : > { %v1490_v48 = vpop.permute.xlu1 %1489 }
 0xeee   : > { %1492 = vst.msk [vmem:[#allocation4] sm:$0xff] %vm557_vm0, %v1490_v48 }
 0xef5   : > { %v1590_v49 = vld [vmem:[#allocation4] sm:$0xff] }
 0xef6   : > { %1592 = vrot.lane.b32.xlu1 %v1590_v49, %s2486_s22 }
 0xf5e   : > { %v1495_v50 = vpop.permute.xlu0 %1494 }
 0xf5f   : > { %1497 = vst.msk [vmem:[#allocation3] sm:$0xff] %vm557_vm0, %v1495_v50  ;;  %2155 = vst.msk [vmem:[%s2906_s8 + $0x20] sm:$0xff] %vm557_vm0, %v1495_v50 }
 0xf66   : > { %v1504_v51 = vld [vmem:[#allocation3] sm:$0xff] }
 0xf67   : > { %2331 = vmatmul.mubr.msk.f32.vlgmr.msra.gmra.mxu1 %vm557_vm0, %v1504_v51 }
 0xf68   : > { %2345 = vmatpush3.msra.mxu1 %v2682_v58  ;;  %2352 = vmatprep.mubr.msk.f32.mxu1 %vm2485_vm2, %v2484_v59 }
 0xf69   : > { %2346 = vmatprep.subr.mxu1 %v2484_v59 }
 0xf6a   : > { %2347 = vmatpush3.msra.mxu1 %v2686_v60 }
 0xf6b   : > { %2348 = vmatprep.subr.mxu1 %v2484_v59 }
 0xf6c   : > { %2349 = vmatpush3.msra.mxu1 %v2694_v61 }
 0xf6d   : > { %2350 = vmatprep.subr.mxu1 %v2484_v59  ;;  %v1593_v59 = vpop.permute.xlu1 %1592 }
 0xf6e   : > { %2351 = vmatpush3.msra.mxu1 %v2701_v62 }
0x1027   : > { %v1578_v53 = vpop.f32.mrf.mxu1 }
0x1028   : > { %v1582_v54 = vadd.f32 %v1578_v53, %v1503_v52 }
0x1029   : > { %v2332_v55 = vpop.f32.mrf.mxu1 }
0x102a   : > { %2436 = vtanh.f32 %v1582_v54  ;;  %v2157_v56 = vmul.f32 -1.442695, %v1582_v54 }
0x102c   : > { %2438 = vpow2.f32 %v2157_v56 }
0x1037   : > { %v2437_v58 = vpop.eup %2436 }
0x1038   : > { %1597 = vrot.lane.b32.xlu0 %v2437_v58, %s2486_s22 }
0x1039   : > { %v2439_v57 = vpop.eup %2438 }
0x103a   : > { %v1586_v60 = vadd.f32 1.0, %v2439_v57 }
0x103c   : > { %2440 = vrcp.f32 %v1586_v60 }
0x1049   : > { %v2441_v63 = vpop.eup %2440 }
0x104a   : > { %v1595_v62 = vmul.f32 %v2441_v63, %v1593_v59 }
0x10aa   : > { %v1598_v0 = vpop.permute.xlu0 %1597 }
0x10ab   : > { %v1600_v61 = vmul.f32 %v2441_v63, %v1598_v0 }
0x10ad   : > { %1602 = vrot.lane.b32.xlu0 %v1600_v61, %s2486_s22 }
0x111f   : > { %v1603_v1 = vpop.permute.xlu0 %1602 }
0x1120   : > { %v1605_v2 = vadd.f32 %v1603_v1, %v1595_v62 }
0x1122   : > { %2442 = vtanh.f32 %v1605_v2 }
0x112f   : > { %v2443_v3 = vpop.eup %2442 }
0x1130   : > { %1608 = vrot.lane.b32.xlu1 %v2443_v3, %s2486_s22 }
0x1134   : > { %1613 = vrot.lane.b32.xlu1 %v1605_v2, %s2487_s17 }
0x11a2   : > { %v1609_v4 = vpop.permute.xlu1 %1608 }
0x11a3   : > { %v1611_v5 = vmul.f32 %v2441_v63, %v1609_v4 }
0x11a5   : > { %1618 = vrot.lane.b32.xlu0 %v1611_v5, %s2488_s18 }
0x11a6   : > { %v1614_v6 = vpop.permute.xlu1 %1613 }
0x11a7   : > { %1616 = vst.msk [vmem:[#allocation4] sm:$0xff] %vm557_vm0, %v1614_v6 }
0x11ae   : > { %v1714_v7 = vld [vmem:[#allocation4] sm:$0xff] }
0x11af   : > { %1716 = vrot.lane.b32.xlu1 %v1714_v7, %s2486_s22 }
0x1217   : > { %v1619_v8 = vpop.permute.xlu0 %1618 }
0x1218   : > { %1621 = vst.msk [vmem:[#allocation3] sm:$0xff] %vm557_vm0, %v1619_v8  ;;  %2158 = vst.msk [vmem:[%s2906_s8 + $0x28] sm:$0xff] %vm557_vm0, %v1619_v8 }
0x121f   : > { %v1628_v9 = vld [vmem:[#allocation3] sm:$0xff] }
0x1220   : > { %2342 = vmatmul.mubr.msk.f32.vlgmr.msra.gmra.mxu0 %vm557_vm0, %v1628_v9 }
0x1221   : > { %v1717_v21 = vpop.permute.xlu1 %1716 }
0x12e0   : > { %v1702_v11 = vpop.f32.mrf.mxu0 }
0x12e1   : > { %v1706_v12 = vadd.f32 %v1702_v11, %v1627_v10 }
0x12e2   : > { %v2343_v13 = vpop.f32.mrf.mxu0 }
0x12e3   : > { %2444 = vtanh.f32 %v1706_v12  ;;  %v2160_v15 = vmul.f32 -1.442695, %v1706_v12 }
0x12e5   : > { %2446 = vpow2.f32 %v2160_v15 }
0x12f0   : > { %v2445_v14 = vpop.eup %2444 }
0x12f1   : > { %1721 = vrot.lane.b32.xlu0 %v2445_v14, %s2486_s22 }
0x12f2   : > { %v2447_v16 = vpop.eup %2446 }
0x12f3   : > { %v1710_v17 = vadd.f32 1.0, %v2447_v16 }
0x12f5   : > { %2448 = vrcp.f32 %v1710_v17 }
0x1302   : > { %v2449_v18 = vpop.eup %2448 }
0x1303   : > { %v1719_v22 = vmul.f32 %v2449_v18, %v1717_v21 }
0x1363   : > { %v1722_v19 = vpop.permute.xlu0 %1721 }
0x1364   : > { %v1724_v20 = vmul.f32 %v2449_v18, %v1722_v19 }
0x1366   : > { %1726 = vrot.lane.b32.xlu0 %v1724_v20, %s2486_s22 }
0x13d8   : > { %v1727_v23 = vpop.permute.xlu0 %1726 }
0x13d9   : > { %v1729_v24 = vadd.f32 %v1727_v23, %v1719_v22 }
0x13db   : > { %2450 = vtanh.f32 %v1729_v24 }
0x13e8   : > { %v2451_v25 = vpop.eup %2450 }
0x13e9   : > { %1732 = vrot.lane.b32.xlu1 %v2451_v25, %s2486_s22 }
0x13ed   : > { %1737 = vrot.lane.b32.xlu1 %v1729_v24, %s2487_s17 }
0x145b   : > { %v1733_v26 = vpop.permute.xlu1 %1732 }
0x145c   : > { %v1735_v27 = vmul.f32 %v2449_v18, %v1733_v26 }
0x145e   : > { %1742 = vrot.lane.b32.xlu0 %v1735_v27, %s2488_s18 }
0x145f   : > { %v1738_v28 = vpop.permute.xlu1 %1737 }
0x1460   : > { %1740 = vst.msk [vmem:[#allocation4] sm:$0xff] %vm557_vm0, %v1738_v28 }
0x1467   : > { %v1838_v29 = vld [vmem:[#allocation4] sm:$0xff] }
0x1468   : > { %1840 = vrot.lane.b32.xlu1 %v1838_v29, %s2486_s22 }
0x14d0   : > { %v1743_v30 = vpop.permute.xlu0 %1742 }
0x14d1   : > { %1745 = vst.msk [vmem:[#allocation3] sm:$0xff] %vm557_vm0, %v1743_v30  ;;  %2161 = vst.msk [vmem:[%s2906_s8 + $0x30] sm:$0xff] %vm557_vm0, %v1743_v30 }
0x14d8   : > { %v1752_v31 = vld [vmem:[#allocation3] sm:$0xff] }
0x14d9   : > { %2353 = vmatmul.mubr.msk.f32.vlgmr.msra.gmra.mxu1 %vm557_vm0, %v1752_v31 }
0x14da   : > { %v1841_v43 = vpop.permute.xlu1 %1840 }
0x1599   : > { %v1826_v33 = vpop.f32.mrf.mxu1 }
0x159a   : > { %v1830_v34 = vadd.f32 %v1826_v33, %v1751_v32 }
0x159b   : > { %v2354_v35 = vpop.f32.mrf.mxu1 }
0x159c   : > { %2452 = vtanh.f32 %v1830_v34  ;;  %v2163_v37 = vmul.f32 -1.442695, %v1830_v34 }
0x159e   : > { %2454 = vpow2.f32 %v2163_v37 }
0x15a9   : > { %v2453_v36 = vpop.eup %2452 }
0x15aa   : > { %1845 = vrot.lane.b32.xlu0 %v2453_v36, %s2486_s22 }
0x15ab   : > { %v2455_v38 = vpop.eup %2454 }
0x15ac   : > { %v1834_v39 = vadd.f32 1.0, %v2455_v38 }
0x15ae   : > { %2456 = vrcp.f32 %v1834_v39 }
0x15bb   : > { %v2457_v40 = vpop.eup %2456 }
0x15bc   : > { %v1843_v44 = vmul.f32 %v2457_v40, %v1841_v43 }
0x161c   : > { %v1846_v41 = vpop.permute.xlu0 %1845 }
0x161d   : > { %v1848_v42 = vmul.f32 %v2457_v40, %v1846_v41 }
0x161f   : > { %1850 = vrot.lane.b32.xlu0 %v1848_v42, %s2486_s22 }
0x1691   : > { %v1851_v45 = vpop.permute.xlu0 %1850 }
0x1692   : > { %v1853_v46 = vadd.f32 %v1851_v45, %v1843_v44 }
0x1694   : > { %2458 = vtanh.f32 %v1853_v46  ;;  %1861 = vrot.lane.b32.xlu0 %v1853_v46, %s2487_s17 }
0x16a1   : > { %v2459_v47 = vpop.eup %2458 }
0x16a2   : > { %1856 = vrot.lane.b32.xlu1 %v2459_v47, %s2486_s22 }
0x1706   : > { %v1862_v48 = vpop.permute.xlu0 %1861 }
0x1707   : > { %1864 = vst.msk [vmem:[#allocation4] sm:$0xff] %vm557_vm0, %v1862_v48 }
0x170e   : > { %v1876_v49 = vld [vmem:[#allocation4] sm:$0xff] }
0x170f   : > { %1877 = vst.msk [vmem:[%s555_s11] sm:$0xff] %vm557_vm0, %v1876_v49 }
0x1714   : > { %v1857_v50 = vpop.permute.xlu1 %1856 }
0x1715   : > { %v1859_v51 = vmul.f32 %v2457_v40, %v1857_v50 }
0x1717   : > { %1866 = vrot.lane.b32.xlu1 %v1859_v51, %s2488_s18 }
0x1789   : > { %v1867_v52 = vpop.permute.xlu1 %1866 }
0x178a   : > { %1869 = vst.msk [vmem:[#allocation3] sm:$0xff] %vm557_vm0, %v1867_v52  ;;  %2164 = vst.msk [vmem:[%s2906_s8 + $0x38] sm:$0xff] %vm557_vm0, %v1867_v52 }
0x1791   : > { %v1874_v53 = vld [vmem:[#allocation3] sm:$0xff] }
0x1792   : > { %1875 = vst.msk [vmem:[%s548_s28] sm:$0xff] %vm557_vm0, %v1874_v53 }
0x1793 PF: > { %s21_s15 = sadd.s32 1, %s2482_s15   ;;  %s2909_s13 = smov %s2478_s14 }
0x1794   : > { %p18_p7 = scmp.ge.s32.totalorder %s21_s15, 4   ;;  %s2910_s14 = smov %s2912_s16 }
0x1796   :  { %20 = sbr.rel (!%p18_p7) target bundleno = 2 (0x2), region = 146 }

</bundles_post_ra>
